<compile_context>
chip_gen: v7x
topology: tpu7x:2x2x1
jax: 0.10.0
libtpu: 0.0.40
codegen_flags: <defaults>
</compile_context>

<pallas_src>
import functools
import math

import jax
import jax.numpy as jnp
from jax.experimental import pallas as pl
from jax.experimental.pallas import tpu as pltpu

# LayerNorm eps matching the canonical transformer EncoderLayer (nn.LayerNorm(..., eps=1e-6)).
# If the reference EncoderLayer uses PyTorch's default eps=1e-5, pass ln_eps=1e-5.
LN_EPS = 1e-6

_WEIGHTS_PER_LAYER = 12


def _layer_norm(x, gamma, beta, eps):
    mu = jnp.mean(x, axis=-1, keepdims=True)
    var = jnp.mean(jnp.square(x - mu), axis=-1, keepdims=True)
    return (x - mu) * jax.lax.rsqrt(var + eps) * gamma + beta


def fin_encoder_kernel(*refs, layer_cfgs, n_head, d_k, d_v, seq_len, ln_eps):
    """Fused FinEncoder stack: all layers execute inside one program.

    refs = (x_ref, <12 weight refs per layer>..., out_ref)
    x_ref: (rows, inp_dim) with rows = (examples in this block) * seq_len.
    """
    x_ref = refs[0]
    out_ref = refs[-1]
    w_refs = refs[1:-1]

    x = x_ref[...].astype(jnp.float32)                       # (R, C0)
    rows = x.shape[0]
    b_blk = rows // seq_len                                   # examples in this block
    g = b_blk * n_head                                        # attention batch = (example, head)
    scale = 1.0 / math.sqrt(d_k)

    for li, (add_res_attn, add_res_ffn) in enumerate(layer_cfgs):
        (wq_ref, wk_ref, wv_ref, wo_ref,
         ln1_g_ref, ln1_b_ref,
         w1_ref, b1_ref, w2_ref, b2_ref,
         ln2_g_ref, ln2_b_ref) = w_refs[li * _WEIGHTS_PER_LAYER:
                                        (li + 1) * _WEIGHTS_PER_LAYER]

        in_size = x.shape[1]
        d_model = wo_ref.shape[2]

        # ---- multi-head self-attention, batched over (example, head) ----
        # Weights arrive pre-split per head as (H, in, d); broadcast over examples so
        # every contraction is a plain 3-D batched matmul (flash-attention patterns),
        # with no lane-dim slicing or reshapes inside the kernel.
        xg = jnp.broadcast_to(
            x.reshape(b_blk, seq_len, in_size)[:, None],
            (b_blk, n_head, seq_len, in_size)).reshape(g, seq_len, in_size)

        def _bcast_w(w):                                      # (H, a, b) -> (G, a, b)
            return jnp.broadcast_to(w[None], (b_blk,) + w.shape).reshape((g,) + w.shape[1:])

        q = jnp.einsum('gtc,gcd->gtd', xg, _bcast_w(wq_ref[...]),
                       preferred_element_type=jnp.float32)    # (G, T, d_k)
        k = jnp.einsum('gtc,gcd->gtd', xg, _bcast_w(wk_ref[...]),
                       preferred_element_type=jnp.float32)    # (G, T, d_k)
        v = jnp.einsum('gtc,gcd->gtd', xg, _bcast_w(wv_ref[...]),
                       preferred_element_type=jnp.float32)    # (G, T, d_v)

        s = jnp.einsum('gqd,gkd->gqk', q, k,
                       preferred_element_type=jnp.float32) * scale      # (G, T, T)
        # TODO(synk): slf_attn_mask (src_mask) not applied — reference path uses None.
        s = s - jnp.max(s, axis=-1, keepdims=True)
        p = jnp.exp(s)
        p = p * pl.reciprocal(jnp.sum(p, axis=-1, keepdims=True), approx=True)

        heads = jnp.einsum('gqk,gkd->gqd', p, v,
                           preferred_element_type=jnp.float32)          # (G, T, d_v)
        # Per-head output projection + sum over heads == concat(heads) @ W_o.
        attn = jnp.einsum('gtd,gdm->gtm', heads, _bcast_w(wo_ref[...]),
                          preferred_element_type=jnp.float32)           # (G, T, d_model)
        attn = jnp.sum(attn.reshape(b_blk, n_head, seq_len, d_model), axis=1)
        attn = attn.reshape(rows, d_model)

        if add_res_attn:
            attn = attn + x
        o = _layer_norm(attn, ln1_g_ref[...], ln1_b_ref[...], ln_eps)

        # ---- position-wise feed-forward ----
        h1 = jnp.dot(o, w1_ref[...], preferred_element_type=jnp.float32) + b1_ref[...]
        h1 = jnp.maximum(h1, 0.0)
        h2 = jnp.dot(h1, w2_ref[...], preferred_element_type=jnp.float32) + b2_ref[...]
        if add_res_ffn:
            h2 = h2 + o
        x = _layer_norm(h2, ln2_g_ref[...], ln2_b_ref[...], ln_eps)

    out_ref[...] = x.astype(out_ref.dtype)


def fin_encoder_forward(src_seq, layers, *, n_head, d_k, d_v,
                        batch_blocks=1, ln_eps=LN_EPS):
    """Run the fused FinEncoder stack as a single pallas_call.

    src_seq: (B, T, inp_dim).  Returns a 1-tuple (enc_output,) like the PyTorch module.
    batch_blocks: grid steps over the batch.  Set 2 on v7x to shard across its two
    TensorCores; keep 1 on v5e/v6e where extra grid steps are a serial loop.
    """
    B, T, inp_dim = src_seq.shape
    assert B % batch_blocks == 0
    rows = B * T
    rows_blk = (B // batch_blocks) * T
    assert batch_blocks == 1 or rows_blk % 8 == 0, "per-block rows must tile sublanes"

    out_dim = layers[-1]["params"]["w2"].shape[1]

    # Flatten (B, T, C) -> (B*T, C): sublane-packed, lane-dense activations / output.
    x2 = src_seq.reshape(rows, inp_dim)

    weights = []
    layer_cfgs = []
    flops = 0
    transcendentals = 0
    for layer in layers:
        p = layer["params"]
        in_size = p["wq"].shape[0]
        d_model = p["wo"].shape[1]
        d_inner = p["w1"].shape[1]
        out_size = p["w2"].shape[1]
        # Pre-split projection weights per head (plain JAX, outside the kernel).
        wq_h = p["wq"].reshape(in_size, n_head, d_k).transpose(1, 0, 2)   # (H, in, d_k)
        wk_h = p["wk"].reshape(in_size, n_head, d_k).transpose(1, 0, 2)   # (H, in, d_k)
        wv_h = p["wv"].reshape(in_size, n_head, d_v).transpose(1, 0, 2)   # (H, in, d_v)
        wo_h = p["wo"].reshape(n_head, d_v, d_model)                      # (H, d_v, d_model)
        weights += [wq_h, wk_h, wv_h, wo_h,
                    p["ln1_g"], p["ln1_b"],
                    p["w1"], p["b1"], p["w2"], p["b2"],
                    p["ln2_g"], p["ln2_b"]]
        layer_cfgs.append((layer["add_res_attn"], layer["add_res_ffn"]))

        flops += 2 * rows * in_size * n_head * (2 * d_k + d_v)            # QKV proj
        flops += 2 * B * n_head * T * T * (d_k + d_v)                     # scores + P@V
        flops += 2 * rows * n_head * d_v * d_model                        # output proj
        flops += 2 * rows * (d_model * d_inner + d_inner * out_size)      # FFN
        transcendentals += B * n_head * T * T + 2 * rows                  # exp + rsqrt

    kernel = functools.partial(
        fin_encoder_kernel, layer_cfgs=tuple(layer_cfgs), n_head=n_head,
        d_k=d_k, d_v=d_v, seq_len=T, ln_eps=ln_eps)

    in_specs = [pl.BlockSpec((rows_blk, inp_dim), lambda i: (i, 0))]
    for w in weights:
        in_specs.append(pl.BlockSpec(w.shape, lambda i, nd=w.ndim: (0,) * nd))

    bytes_accessed = (int(x2.nbytes) + rows * out_dim * x2.dtype.itemsize
                      + sum(int(w.nbytes) for w in weights))

    out2 = pl.pallas_call(
        kernel,
        out_shape=jax.ShapeDtypeStruct((rows, out_dim), src_seq.dtype),
        grid_spec=pltpu.PrefetchScalarGridSpec(
            num_scalar_prefetch=0,
            grid=(batch_blocks,),
            in_specs=in_specs,
            out_specs=pl.BlockSpec((rows_blk, out_dim), lambda i: (i, 0)),
        ),
        compiler_params=pltpu.CompilerParams(
            dimension_semantics=("parallel",)),
        cost_estimate=pl.CostEstimate(
            flops=int(flops), transcendentals=int(transcendentals),
            bytes_accessed=int(bytes_accessed)),
    )(x2, *weights)

    return (out2.reshape(B, T, out_dim),)


def init_fin_encoder_params(key, *, inp_dim, out_dim, n_layers, n_head,
                            d_k, d_v, d_model, d_inner):
    """Linear weights stored pre-transposed as [in_features, out_features]."""
    def unif(k, shape, fan_in):
        bound = fan_in ** -0.5
        return jax.random.uniform(k, shape, jnp.float32, -bound, bound)

    layers = []
    for i in range(n_layers):
        inp_size = inp_dim if i == 0 else d_model
        out_size = d_model if i < n_layers - 1 else out_dim
        key, *ks = jax.random.split(key, 9)
        p = dict(
            wq=unif(ks[0], (inp_size, n_head * d_k), inp_size),
            wk=unif(ks[1], (inp_size, n_head * d_k), inp_size),
            wv=unif(ks[2], (inp_size, n_head * d_v), inp_size),
            wo=unif(ks[3], (n_head * d_v, d_model), n_head * d_v),
            ln1_g=jnp.ones((1, d_model), jnp.float32),
            ln1_b=jnp.zeros((1, d_model), jnp.float32),
            w1=unif(ks[4], (d_model, d_inner), d_model),
            b1=unif(ks[5], (1, d_inner), d_model),
            w2=unif(ks[6], (d_inner, out_size), d_inner),
            b2=unif(ks[7], (1, out_size), d_inner),
            ln2_g=jnp.ones((1, out_size), jnp.float32),
            ln2_b=jnp.zeros((1, out_size), jnp.float32),
        )
        layers.append(dict(
            params=p,
            add_res_attn=(inp_size == d_model),
            add_res_ffn=(out_size == d_model),
        ))
    return layers


if __name__ == "__main__":
    # small shapes consistent with FinEncoder's forward
    B, T = 2, 8
    inp_dim, out_dim = 16, 16
    n_layers, n_head, d_k, d_v = 2, 4, 8, 8
    d_model, d_inner = 32, 64

    key = jax.random.PRNGKey(0)
    kx, kp = jax.random.split(key)
    src_seq = jax.random.normal(kx, (B, T, inp_dim), jnp.float32)

    layers = init_fin_encoder_params(
        kp, inp_dim=inp_dim, out_dim=out_dim, n_layers=n_layers,
        n_head=n_head, d_k=d_k, d_v=d_v, d_model=d_model, d_inner=d_inner)

    (enc_out,) = fin_encoder_forward(src_seq, layers, n_head=n_head, d_k=d_k, d_v=d_v)
    enc_out = jax.block_until_ready(enc_out)

    assert enc_out.shape == (B, T, out_dim), enc_out.shape
    assert bool(jnp.all(jnp.isfinite(enc_out)))
    print("KERNEL_OK")
</pallas_src>

<mosaic_0001>
module attributes {stable_mosaic.version = 11 : i64} {
  func.func @fin_encoder_kernel(%arg0: i32, %arg1: memref<16x16xf32, #tpu.memory_space<vmem>>, %arg2: memref<4x16x8xf32, #tpu.memory_space<vmem>>, %arg3: memref<4x16x8xf32, #tpu.memory_space<vmem>>, %arg4: memref<4x16x8xf32, #tpu.memory_space<vmem>>, %arg5: memref<4x8x32xf32, #tpu.memory_space<vmem>>, %arg6: memref<1x32xf32, #tpu.memory_space<vmem>>, %arg7: memref<1x32xf32, #tpu.memory_space<vmem>>, %arg8: memref<32x64xf32, #tpu.memory_space<vmem>>, %arg9: memref<1x64xf32, #tpu.memory_space<vmem>>, %arg10: memref<64x32xf32, #tpu.memory_space<vmem>>, %arg11: memref<1x32xf32, #tpu.memory_space<vmem>>, %arg12: memref<1x32xf32, #tpu.memory_space<vmem>>, %arg13: memref<1x32xf32, #tpu.memory_space<vmem>>, %arg14: memref<4x32x8xf32, #tpu.memory_space<vmem>>, %arg15: memref<4x32x8xf32, #tpu.memory_space<vmem>>, %arg16: memref<4x32x8xf32, #tpu.memory_space<vmem>>, %arg17: memref<4x8x32xf32, #tpu.memory_space<vmem>>, %arg18: memref<1x32xf32, #tpu.memory_space<vmem>>, %arg19: memref<1x32xf32, #tpu.memory_space<vmem>>, %arg20: memref<32x64xf32, #tpu.memory_space<vmem>>, %arg21: memref<1x64xf32, #tpu.memory_space<vmem>>, %arg22: memref<64x16xf32, #tpu.memory_space<vmem>>, %arg23: memref<1x16xf32, #tpu.memory_space<vmem>>, %arg24: memref<1x16xf32, #tpu.memory_space<vmem>>, %arg25: memref<1x16xf32, #tpu.memory_space<vmem>>, %arg26: memref<16x16xf32, #tpu.memory_space<vmem>>) attributes {dimension_semantics = [#tpu.dimension_semantics<parallel>], iteration_bounds = array<i64: 1>, scalar_prefetch = 0 : i64, scratch_operands = 0 : i64, tpu.core_type = #tpu.core_type<tc>, window_params = [{transform_indices = @transform_0, window_bounds = array<i64: 16, 16>}, {pipeline_mode = #tpu.pipeline_mode<synchronous>, transform_indices = @transform_1, window_bounds = array<i64: 4, 16, 8>}, {pipeline_mode = #tpu.pipeline_mode<synchronous>, transform_indices = @transform_2, window_bounds = array<i64: 4, 16, 8>}, {pipeline_mode = #tpu.pipeline_mode<synchronous>, transform_indices = @transform_3, window_bounds = array<i64: 4, 16, 8>}, {pipeline_mode = #tpu.pipeline_mode<synchronous>, transform_indices = @transform_4, window_bounds = array<i64: 4, 8, 32>}, {pipeline_mode = #tpu.pipeline_mode<synchronous>, transform_indices = @transform_5, window_bounds = array<i64: 1, 32>}, {pipeline_mode = #tpu.pipeline_mode<synchronous>, transform_indices = @transform_6, window_bounds = array<i64: 1, 32>}, {pipeline_mode = #tpu.pipeline_mode<synchronous>, transform_indices = @transform_7, window_bounds = array<i64: 32, 64>}, {pipeline_mode = #tpu.pipeline_mode<synchronous>, transform_indices = @transform_8, window_bounds = array<i64: 1, 64>}, {pipeline_mode = #tpu.pipeline_mode<synchronous>, transform_indices = @transform_9, window_bounds = array<i64: 64, 32>}, {pipeline_mode = #tpu.pipeline_mode<synchronous>, transform_indices = @transform_10, window_bounds = array<i64: 1, 32>}, {pipeline_mode = #tpu.pipeline_mode<synchronous>, transform_indices = @transform_11, window_bounds = array<i64: 1, 32>}, {pipeline_mode = #tpu.pipeline_mode<synchronous>, transform_indices = @transform_12, window_bounds = array<i64: 1, 32>}, {pipeline_mode = #tpu.pipeline_mode<synchronous>, transform_indices = @transform_13, window_bounds = array<i64: 4, 32, 8>}, {pipeline_mode = #tpu.pipeline_mode<synchronous>, transform_indices = @transform_14, window_bounds = array<i64: 4, 32, 8>}, {pipeline_mode = #tpu.pipeline_mode<synchronous>, transform_indices = @transform_15, window_bounds = array<i64: 4, 32, 8>}, {pipeline_mode = #tpu.pipeline_mode<synchronous>, transform_indices = @transform_16, window_bounds = array<i64: 4, 8, 32>}, {pipeline_mode = #tpu.pipeline_mode<synchronous>, transform_indices = @transform_17, window_bounds = array<i64: 1, 32>}, {pipeline_mode = #tpu.pipeline_mode<synchronous>, transform_indices = @transform_18, window_bounds = array<i64: 1, 32>}, {pipeline_mode = #tpu.pipeline_mode<synchronous>, transform_indices = @transform_19, window_bounds = array<i64: 32, 64>}, {pipeline_mode = #tpu.pipeline_mode<synchronous>, transform_indices = @transform_20, window_bounds = array<i64: 1, 64>}, {pipeline_mode = #tpu.pipeline_mode<synchronous>, transform_indices = @transform_21, window_bounds = array<i64: 64, 16>}, {pipeline_mode = #tpu.pipeline_mode<synchronous>, transform_indices = @transform_22, window_bounds = array<i64: 1, 16>}, {pipeline_mode = #tpu.pipeline_mode<synchronous>, transform_indices = @transform_23, window_bounds = array<i64: 1, 16>}, {pipeline_mode = #tpu.pipeline_mode<synchronous>, transform_indices = @transform_24, window_bounds = array<i64: 1, 16>}, {transform_indices = @transform_25, window_bounds = array<i64: 16, 16>}]} {
    %c0 = arith.constant 0 : index
    %c0_0 = arith.constant 0 : index
    %0 = vector.load %arg1[%c0, %c0_0] : memref<16x16xf32, #tpu.memory_space<vmem>>, vector<16x16xf32>
    %1 = vector.shape_cast %0 : vector<16x16xf32> to vector<2x8x16xf32>
    %2 = vector.shape_cast %1 : vector<2x8x16xf32> to vector<2x1x8x16xf32>
    %3 = vector.shape_cast %2 : vector<2x1x8x16xf32> to vector<2x1x8x16xf32>
    %4 = vector.broadcast %3 : vector<2x1x8x16xf32> to vector<2x4x8x16xf32>
    %5 = vector.shape_cast %4 : vector<2x4x8x16xf32> to vector<8x8x16xf32>
    %c0_1 = arith.constant 0 : index
    %c0_2 = arith.constant 0 : index
    %c0_3 = arith.constant 0 : index
    %6 = vector.load %arg2[%c0_1, %c0_2, %c0_3] : memref<4x16x8xf32, #tpu.memory_space<vmem>>, vector<4x16x8xf32>
    %7 = vector.shape_cast %6 : vector<4x16x8xf32> to vector<1x4x16x8xf32>
    %8 = vector.shape_cast %7 : vector<1x4x16x8xf32> to vector<1x4x16x8xf32>
    %9 = vector.broadcast %8 : vector<1x4x16x8xf32> to vector<2x4x16x8xf32>
    %10 = vector.shape_cast %9 : vector<2x4x16x8xf32> to vector<8x16x8xf32>
    "tpu.trace_start"() <{level = 10 : i32, message = "gtc,gcd->gtd"}> : () -> ()
    %cst = arith.constant dense<0.000000e+00> : vector<8x8x8xf32>
    %11 = tpu.matmul %5, %10, %cst {dimension_numbers = #tpu.dot_dimension_numbers<[2], [1], [1], [2], [0, 0, 0, 1, 1, 2], [0], [0]>} : vector<8x8x16xf32>, vector<8x16x8xf32>, vector<8x8x8xf32> -> vector<8x8x8xf32>
    "tpu.trace_stop"() : () -> ()
    %c0_4 = arith.constant 0 : index
    %c0_5 = arith.constant 0 : index
    %c0_6 = arith.constant 0 : index
    %12 = vector.load %arg3[%c0_4, %c0_5, %c0_6] : memref<4x16x8xf32, #tpu.memory_space<vmem>>, vector<4x16x8xf32>
    %13 = vector.shape_cast %12 : vector<4x16x8xf32> to vector<1x4x16x8xf32>
    %14 = vector.shape_cast %13 : vector<1x4x16x8xf32> to vector<1x4x16x8xf32>
    %15 = vector.broadcast %14 : vector<1x4x16x8xf32> to vector<2x4x16x8xf32>
    %16 = vector.shape_cast %15 : vector<2x4x16x8xf32> to vector<8x16x8xf32>
    "tpu.trace_start"() <{level = 10 : i32, message = "gtc,gcd->gtd"}> : () -> ()
    %cst_7 = arith.constant dense<0.000000e+00> : vector<8x8x8xf32>
    %17 = tpu.matmul %5, %16, %cst_7 {dimension_numbers = #tpu.dot_dimension_numbers<[2], [1], [1], [2], [0, 0, 0, 1, 1, 2], [0], [0]>} : vector<8x8x16xf32>, vector<8x16x8xf32>, vector<8x8x8xf32> -> vector<8x8x8xf32>
    "tpu.trace_stop"() : () -> ()
    %c0_8 = arith.constant 0 : index
    %c0_9 = arith.constant 0 : index
    %c0_10 = arith.constant 0 : index
    %18 = vector.load %arg4[%c0_8, %c0_9, %c0_10] : memref<4x16x8xf32, #tpu.memory_space<vmem>>, vector<4x16x8xf32>
    %19 = vector.shape_cast %18 : vector<4x16x8xf32> to vector<1x4x16x8xf32>
    %20 = vector.shape_cast %19 : vector<1x4x16x8xf32> to vector<1x4x16x8xf32>
    %21 = vector.broadcast %20 : vector<1x4x16x8xf32> to vector<2x4x16x8xf32>
    %22 = vector.shape_cast %21 : vector<2x4x16x8xf32> to vector<8x16x8xf32>
    "tpu.trace_start"() <{level = 10 : i32, message = "gtc,gcd->gtd"}> : () -> ()
    %cst_11 = arith.constant dense<0.000000e+00> : vector<8x8x8xf32>
    %23 = tpu.matmul %5, %22, %cst_11 {dimension_numbers = #tpu.dot_dimension_numbers<[2], [1], [1], [2], [0, 0, 0, 1, 1, 2], [0], [0]>} : vector<8x8x16xf32>, vector<8x16x8xf32>, vector<8x8x8xf32> -> vector<8x8x8xf32>
    "tpu.trace_stop"() : () -> ()
    "tpu.trace_start"() <{level = 10 : i32, message = "gqd,gkd->gqk"}> : () -> ()
    %cst_12 = arith.constant dense<0.000000e+00> : vector<8x8x8xf32>
    %24 = tpu.matmul %11, %17, %cst_12 {dimension_numbers = #tpu.dot_dimension_numbers<[2], [2], [1], [1], [0, 0, 0, 1, 1, 1], [0], [0]>} : vector<8x8x8xf32>, vector<8x8x8xf32>, vector<8x8x8xf32> -> vector<8x8x8xf32>
    "tpu.trace_stop"() : () -> ()
    %cst_13 = arith.constant 0.353553385 : f32
    %25 = vector.broadcast %cst_13 : f32 to vector<8x8x8xf32>
    %26 = arith.mulf %24, %25 : vector<8x8x8xf32>
    %cst_14 = arith.constant dense<0xFF800000> : vector<8x8xf32>
    %27 = vector.multi_reduction <maximumf>, %26, %cst_14 [2] : vector<8x8x8xf32> to vector<8x8xf32>
    %28 = vector.shape_cast %27 : vector<8x8xf32> to vector<8x8x1xf32>
    %29 = vector.broadcast %28 : vector<8x8x1xf32> to vector<8x8x8xf32>
    %30 = arith.subf %26, %29 : vector<8x8x8xf32>
    %31 = math.exp %30 : vector<8x8x8xf32>
    %cst_15 = arith.constant dense<0.000000e+00> : vector<8x8xf32>
    %32 = vector.multi_reduction <add>, %31, %cst_15 [2] : vector<8x8x8xf32> to vector<8x8xf32>
    %33 = vector.shape_cast %32 : vector<8x8xf32> to vector<8x8x1xf32>
    %34 = tpu.reciprocal %33 {approx = true} : vector<8x8x1xf32> -> vector<8x8x1xf32>
    %35 = vector.broadcast %34 : vector<8x8x1xf32> to vector<8x8x8xf32>
    %36 = arith.mulf %31, %35 : vector<8x8x8xf32>
    "tpu.trace_start"() <{level = 10 : i32, message = "gqk,gkd->gqd"}> : () -> ()
    %cst_16 = arith.constant dense<0.000000e+00> : vector<8x8x8xf32>
    %37 = tpu.matmul %36, %23, %cst_16 {dimension_numbers = #tpu.dot_dimension_numbers<[2], [1], [1], [2], [0, 0, 0, 1, 1, 2], [0], [0]>} : vector<8x8x8xf32>, vector<8x8x8xf32>, vector<8x8x8xf32> -> vector<8x8x8xf32>
    "tpu.trace_stop"() : () -> ()
    %c0_17 = arith.constant 0 : index
    %c0_18 = arith.constant 0 : index
    %c0_19 = arith.constant 0 : index
    %38 = vector.load %arg5[%c0_17, %c0_18, %c0_19] : memref<4x8x32xf32, #tpu.memory_space<vmem>>, vector<4x8x32xf32>
    %39 = vector.shape_cast %38 : vector<4x8x32xf32> to vector<1x4x8x32xf32>
    %40 = vector.shape_cast %39 : vector<1x4x8x32xf32> to vector<1x4x8x32xf32>
    %41 = vector.broadcast %40 : vector<1x4x8x32xf32> to vector<2x4x8x32xf32>
    %42 = vector.shape_cast %41 : vector<2x4x8x32xf32> to vector<8x8x32xf32>
    "tpu.trace_start"() <{level = 10 : i32, message = "gtd,gdm->gtm"}> : () -> ()
    %cst_20 = arith.constant dense<0.000000e+00> : vector<8x8x32xf32>
    %43 = tpu.matmul %37, %42, %cst_20 {dimension_numbers = #tpu.dot_dimension_numbers<[2], [1], [1], [2], [0, 0, 0, 1, 1, 2], [0], [0]>} : vector<8x8x8xf32>, vector<8x8x32xf32>, vector<8x8x32xf32> -> vector<8x8x32xf32>
    "tpu.trace_stop"() : () -> ()
    %44 = vector.shape_cast %43 : vector<8x8x32xf32> to vector<2x4x8x32xf32>
    %cst_21 = arith.constant dense<0.000000e+00> : vector<2x8x32xf32>
    %45 = vector.multi_reduction <add>, %44, %cst_21 [1] : vector<2x4x8x32xf32> to vector<2x8x32xf32>
    %46 = vector.shape_cast %45 : vector<2x8x32xf32> to vector<16x32xf32>
    %c0_22 = arith.constant 0 : index
    %c0_23 = arith.constant 0 : index
    %47 = vector.load %arg6[%c0_22, %c0_23] : memref<1x32xf32, #tpu.memory_space<vmem>>, vector<1x32xf32>
    %c0_24 = arith.constant 0 : index
    %c0_25 = arith.constant 0 : index
    %48 = vector.load %arg7[%c0_24, %c0_25] : memref<1x32xf32, #tpu.memory_space<vmem>>, vector<1x32xf32>
    %cst_26 = arith.constant dense<0.000000e+00> : vector<16xf32>
    %49 = vector.multi_reduction <add>, %46, %cst_26 [1] : vector<16x32xf32> to vector<16xf32>
    %50 = vector.shape_cast %49 : vector<16xf32> to vector<16x1xf32>
    %cst_27 = arith.constant 3.200000e+01 : f32
    %51 = vector.broadcast %cst_27 : f32 to vector<16x1xf32>
    %52 = arith.divf %50, %51 : vector<16x1xf32>
    %53 = vector.broadcast %52 : vector<16x1xf32> to vector<16x32xf32>
    %54 = arith.subf %46, %53 : vector<16x32xf32>
    %55 = arith.mulf %54, %54 : vector<16x32xf32>
    %cst_28 = arith.constant dense<0.000000e+00> : vector<16xf32>
    %56 = vector.multi_reduction <add>, %55, %cst_28 [1] : vector<16x32xf32> to vector<16xf32>
    %57 = vector.shape_cast %56 : vector<16xf32> to vector<16x1xf32>
    %cst_29 = arith.constant 3.200000e+01 : f32
    %58 = vector.broadcast %cst_29 : f32 to vector<16x1xf32>
    %59 = arith.divf %57, %58 : vector<16x1xf32>
    %60 = vector.broadcast %52 : vector<16x1xf32> to vector<16x32xf32>
    %61 = arith.subf %46, %60 : vector<16x32xf32>
    %cst_30 = arith.constant 9.99999997E-7 : f32
    %62 = vector.broadcast %cst_30 : f32 to vector<16x1xf32>
    %63 = arith.addf %59, %62 : vector<16x1xf32>
    %64 = math.rsqrt %63 : vector<16x1xf32>
    %65 = vector.broadcast %64 : vector<16x1xf32> to vector<16x32xf32>
    %66 = arith.mulf %61, %65 : vector<16x32xf32>
    %67 = vector.broadcast %47 : vector<1x32xf32> to vector<16x32xf32>
    %68 = arith.mulf %66, %67 : vector<16x32xf32>
    %69 = vector.broadcast %48 : vector<1x32xf32> to vector<16x32xf32>
    %70 = arith.addf %68, %69 : vector<16x32xf32>
    %c0_31 = arith.constant 0 : index
    %c0_32 = arith.constant 0 : index
    %71 = vector.load %arg8[%c0_31, %c0_32] : memref<32x64xf32, #tpu.memory_space<vmem>>, vector<32x64xf32>
    %cst_33 = arith.constant dense<0.000000e+00> : vector<16x64xf32>
    %72 = tpu.matmul %70, %71, %cst_33 {dimension_numbers = #tpu.dot_dimension_numbers<[1], [0], [0], [1], [0, 0, 1, 1], [], []>} : vector<16x32xf32>, vector<32x64xf32>, vector<16x64xf32> -> vector<16x64xf32>
    %c0_34 = arith.constant 0 : index
    %c0_35 = arith.constant 0 : index
    %73 = vector.load %arg9[%c0_34, %c0_35] : memref<1x64xf32, #tpu.memory_space<vmem>>, vector<1x64xf32>
    %74 = vector.broadcast %73 : vector<1x64xf32> to vector<16x64xf32>
    %75 = arith.addf %72, %74 : vector<16x64xf32>
    %cst_36 = arith.constant 0.000000e+00 : f32
    %76 = vector.broadcast %cst_36 : f32 to vector<16x64xf32>
    %77 = arith.maximumf %75, %76 : vector<16x64xf32>
    %c0_37 = arith.constant 0 : index
    %c0_38 = arith.constant 0 : index
    %78 = vector.load %arg10[%c0_37, %c0_38] : memref<64x32xf32, #tpu.memory_space<vmem>>, vector<64x32xf32>
    %cst_39 = arith.constant dense<0.000000e+00> : vector<16x32xf32>
    %79 = tpu.matmul %77, %78, %cst_39 {dimension_numbers = #tpu.dot_dimension_numbers<[1], [0], [0], [1], [0, 0, 1, 1], [], []>} : vector<16x64xf32>, vector<64x32xf32>, vector<16x32xf32> -> vector<16x32xf32>
    %c0_40 = arith.constant 0 : index
    %c0_41 = arith.constant 0 : index
    %80 = vector.load %arg11[%c0_40, %c0_41] : memref<1x32xf32, #tpu.memory_space<vmem>>, vector<1x32xf32>
    %81 = vector.broadcast %80 : vector<1x32xf32> to vector<16x32xf32>
    %82 = arith.addf %79, %81 : vector<16x32xf32>
    %83 = arith.addf %82, %70 : vector<16x32xf32>
    %c0_42 = arith.constant 0 : index
    %c0_43 = arith.constant 0 : index
    %84 = vector.load %arg12[%c0_42, %c0_43] : memref<1x32xf32, #tpu.memory_space<vmem>>, vector<1x32xf32>
    %c0_44 = arith.constant 0 : index
    %c0_45 = arith.constant 0 : index
    %85 = vector.load %arg13[%c0_44, %c0_45] : memref<1x32xf32, #tpu.memory_space<vmem>>, vector<1x32xf32>
    %cst_46 = arith.constant dense<0.000000e+00> : vector<16xf32>
    %86 = vector.multi_reduction <add>, %83, %cst_46 [1] : vector<16x32xf32> to vector<16xf32>
    %87 = vector.shape_cast %86 : vector<16xf32> to vector<16x1xf32>
    %cst_47 = arith.constant 3.200000e+01 : f32
    %88 = vector.broadcast %cst_47 : f32 to vector<16x1xf32>
    %89 = arith.divf %87, %88 : vector<16x1xf32>
    %90 = vector.broadcast %89 : vector<16x1xf32> to vector<16x32xf32>
    %91 = arith.subf %83, %90 : vector<16x32xf32>
    %92 = arith.mulf %91, %91 : vector<16x32xf32>
    %cst_48 = arith.constant dense<0.000000e+00> : vector<16xf32>
    %93 = vector.multi_reduction <add>, %92, %cst_48 [1] : vector<16x32xf32> to vector<16xf32>
    %94 = vector.shape_cast %93 : vector<16xf32> to vector<16x1xf32>
    %cst_49 = arith.constant 3.200000e+01 : f32
    %95 = vector.broadcast %cst_49 : f32 to vector<16x1xf32>
    %96 = arith.divf %94, %95 : vector<16x1xf32>
    %97 = vector.broadcast %89 : vector<16x1xf32> to vector<16x32xf32>
    %98 = arith.subf %83, %97 : vector<16x32xf32>
    %cst_50 = arith.constant 9.99999997E-7 : f32
    %99 = vector.broadcast %cst_50 : f32 to vector<16x1xf32>
    %100 = arith.addf %96, %99 : vector<16x1xf32>
    %101 = math.rsqrt %100 : vector<16x1xf32>
    %102 = vector.broadcast %101 : vector<16x1xf32> to vector<16x32xf32>
    %103 = arith.mulf %98, %102 : vector<16x32xf32>
    %104 = vector.broadcast %84 : vector<1x32xf32> to vector<16x32xf32>
    %105 = arith.mulf %103, %104 : vector<16x32xf32>
    %106 = vector.broadcast %85 : vector<1x32xf32> to vector<16x32xf32>
    %107 = arith.addf %105, %106 : vector<16x32xf32>
    %108 = vector.shape_cast %107 : vector<16x32xf32> to vector<2x8x32xf32>
    %109 = vector.shape_cast %108 : vector<2x8x32xf32> to vector<2x1x8x32xf32>
    %110 = vector.shape_cast %109 : vector<2x1x8x32xf32> to vector<2x1x8x32xf32>
    %111 = vector.broadcast %110 : vector<2x1x8x32xf32> to vector<2x4x8x32xf32>
    %112 = vector.shape_cast %111 : vector<2x4x8x32xf32> to vector<8x8x32xf32>
    %c0_51 = arith.constant 0 : index
    %c0_52 = arith.constant 0 : index
    %c0_53 = arith.constant 0 : index
    %113 = vector.load %arg14[%c0_51, %c0_52, %c0_53] : memref<4x32x8xf32, #tpu.memory_space<vmem>>, vector<4x32x8xf32>
    %114 = vector.shape_cast %113 : vector<4x32x8xf32> to vector<1x4x32x8xf32>
    %115 = vector.shape_cast %114 : vector<1x4x32x8xf32> to vector<1x4x32x8xf32>
    %116 = vector.broadcast %115 : vector<1x4x32x8xf32> to vector<2x4x32x8xf32>
    %117 = vector.shape_cast %116 : vector<2x4x32x8xf32> to vector<8x32x8xf32>
    "tpu.trace_start"() <{level = 10 : i32, message = "gtc,gcd->gtd"}> : () -> ()
    %cst_54 = arith.constant dense<0.000000e+00> : vector<8x8x8xf32>
    %118 = tpu.matmul %112, %117, %cst_54 {dimension_numbers = #tpu.dot_dimension_numbers<[2], [1], [1], [2], [0, 0, 0, 1, 1, 2], [0], [0]>} : vector<8x8x32xf32>, vector<8x32x8xf32>, vector<8x8x8xf32> -> vector<8x8x8xf32>
    "tpu.trace_stop"() : () -> ()
    %c0_55 = arith.constant 0 : index
    %c0_56 = arith.constant 0 : index
    %c0_57 = arith.constant 0 : index
    %119 = vector.load %arg15[%c0_55, %c0_56, %c0_57] : memref<4x32x8xf32, #tpu.memory_space<vmem>>, vector<4x32x8xf32>
    %120 = vector.shape_cast %119 : vector<4x32x8xf32> to vector<1x4x32x8xf32>
    %121 = vector.shape_cast %120 : vector<1x4x32x8xf32> to vector<1x4x32x8xf32>
    %122 = vector.broadcast %121 : vector<1x4x32x8xf32> to vector<2x4x32x8xf32>
    %123 = vector.shape_cast %122 : vector<2x4x32x8xf32> to vector<8x32x8xf32>
    "tpu.trace_start"() <{level = 10 : i32, message = "gtc,gcd->gtd"}> : () -> ()
    %cst_58 = arith.constant dense<0.000000e+00> : vector<8x8x8xf32>
    %124 = tpu.matmul %112, %123, %cst_58 {dimension_numbers = #tpu.dot_dimension_numbers<[2], [1], [1], [2], [0, 0, 0, 1, 1, 2], [0], [0]>} : vector<8x8x32xf32>, vector<8x32x8xf32>, vector<8x8x8xf32> -> vector<8x8x8xf32>
    "tpu.trace_stop"() : () -> ()
    %c0_59 = arith.constant 0 : index
    %c0_60 = arith.constant 0 : index
    %c0_61 = arith.constant 0 : index
    %125 = vector.load %arg16[%c0_59, %c0_60, %c0_61] : memref<4x32x8xf32, #tpu.memory_space<vmem>>, vector<4x32x8xf32>
    %126 = vector.shape_cast %125 : vector<4x32x8xf32> to vector<1x4x32x8xf32>
    %127 = vector.shape_cast %126 : vector<1x4x32x8xf32> to vector<1x4x32x8xf32>
    %128 = vector.broadcast %127 : vector<1x4x32x8xf32> to vector<2x4x32x8xf32>
    %129 = vector.shape_cast %128 : vector<2x4x32x8xf32> to vector<8x32x8xf32>
    "tpu.trace_start"() <{level = 10 : i32, message = "gtc,gcd->gtd"}> : () -> ()
    %cst_62 = arith.constant dense<0.000000e+00> : vector<8x8x8xf32>
    %130 = tpu.matmul %112, %129, %cst_62 {dimension_numbers = #tpu.dot_dimension_numbers<[2], [1], [1], [2], [0, 0, 0, 1, 1, 2], [0], [0]>} : vector<8x8x32xf32>, vector<8x32x8xf32>, vector<8x8x8xf32> -> vector<8x8x8xf32>
    "tpu.trace_stop"() : () -> ()
    "tpu.trace_start"() <{level = 10 : i32, message = "gqd,gkd->gqk"}> : () -> ()
    %cst_63 = arith.constant dense<0.000000e+00> : vector<8x8x8xf32>
    %131 = tpu.matmul %118, %124, %cst_63 {dimension_numbers = #tpu.dot_dimension_numbers<[2], [2], [1], [1], [0, 0, 0, 1, 1, 1], [0], [0]>} : vector<8x8x8xf32>, vector<8x8x8xf32>, vector<8x8x8xf32> -> vector<8x8x8xf32>
    "tpu.trace_stop"() : () -> ()
    %cst_64 = arith.constant 0.353553385 : f32
    %132 = vector.broadcast %cst_64 : f32 to vector<8x8x8xf32>
    %133 = arith.mulf %131, %132 : vector<8x8x8xf32>
    %cst_65 = arith.constant dense<0xFF800000> : vector<8x8xf32>
    %134 = vector.multi_reduction <maximumf>, %133, %cst_65 [2] : vector<8x8x8xf32> to vector<8x8xf32>
    %135 = vector.shape_cast %134 : vector<8x8xf32> to vector<8x8x1xf32>
    %136 = vector.broadcast %135 : vector<8x8x1xf32> to vector<8x8x8xf32>
    %137 = arith.subf %133, %136 : vector<8x8x8xf32>
    %138 = math.exp %137 : vector<8x8x8xf32>
    %cst_66 = arith.constant dense<0.000000e+00> : vector<8x8xf32>
    %139 = vector.multi_reduction <add>, %138, %cst_66 [2] : vector<8x8x8xf32> to vector<8x8xf32>
    %140 = vector.shape_cast %139 : vector<8x8xf32> to vector<8x8x1xf32>
    %141 = tpu.reciprocal %140 {approx = true} : vector<8x8x1xf32> -> vector<8x8x1xf32>
    %142 = vector.broadcast %141 : vector<8x8x1xf32> to vector<8x8x8xf32>
    %143 = arith.mulf %138, %142 : vector<8x8x8xf32>
    "tpu.trace_start"() <{level = 10 : i32, message = "gqk,gkd->gqd"}> : () -> ()
    %cst_67 = arith.constant dense<0.000000e+00> : vector<8x8x8xf32>
    %144 = tpu.matmul %143, %130, %cst_67 {dimension_numbers = #tpu.dot_dimension_numbers<[2], [1], [1], [2], [0, 0, 0, 1, 1, 2], [0], [0]>} : vector<8x8x8xf32>, vector<8x8x8xf32>, vector<8x8x8xf32> -> vector<8x8x8xf32>
    "tpu.trace_stop"() : () -> ()
    %c0_68 = arith.constant 0 : index
    %c0_69 = arith.constant 0 : index
    %c0_70 = arith.constant 0 : index
    %145 = vector.load %arg17[%c0_68, %c0_69, %c0_70] : memref<4x8x32xf32, #tpu.memory_space<vmem>>, vector<4x8x32xf32>
    %146 = vector.shape_cast %145 : vector<4x8x32xf32> to vector<1x4x8x32xf32>
    %147 = vector.shape_cast %146 : vector<1x4x8x32xf32> to vector<1x4x8x32xf32>
    %148 = vector.broadcast %147 : vector<1x4x8x32xf32> to vector<2x4x8x32xf32>
    %149 = vector.shape_cast %148 : vector<2x4x8x32xf32> to vector<8x8x32xf32>
    "tpu.trace_start"() <{level = 10 : i32, message = "gtd,gdm->gtm"}> : () -> ()
    %cst_71 = arith.constant dense<0.000000e+00> : vector<8x8x32xf32>
    %150 = tpu.matmul %144, %149, %cst_71 {dimension_numbers = #tpu.dot_dimension_numbers<[2], [1], [1], [2], [0, 0, 0, 1, 1, 2], [0], [0]>} : vector<8x8x8xf32>, vector<8x8x32xf32>, vector<8x8x32xf32> -> vector<8x8x32xf32>
    "tpu.trace_stop"() : () -> ()
    %151 = vector.shape_cast %150 : vector<8x8x32xf32> to vector<2x4x8x32xf32>
    %cst_72 = arith.constant dense<0.000000e+00> : vector<2x8x32xf32>
    %152 = vector.multi_reduction <add>, %151, %cst_72 [1] : vector<2x4x8x32xf32> to vector<2x8x32xf32>
    %153 = vector.shape_cast %152 : vector<2x8x32xf32> to vector<16x32xf32>
    %154 = arith.addf %153, %107 : vector<16x32xf32>
    %c0_73 = arith.constant 0 : index
    %c0_74 = arith.constant 0 : index
    %155 = vector.load %arg18[%c0_73, %c0_74] : memref<1x32xf32, #tpu.memory_space<vmem>>, vector<1x32xf32>
    %c0_75 = arith.constant 0 : index
    %c0_76 = arith.constant 0 : index
    %156 = vector.load %arg19[%c0_75, %c0_76] : memref<1x32xf32, #tpu.memory_space<vmem>>, vector<1x32xf32>
    %cst_77 = arith.constant dense<0.000000e+00> : vector<16xf32>
    %157 = vector.multi_reduction <add>, %154, %cst_77 [1] : vector<16x32xf32> to vector<16xf32>
    %158 = vector.shape_cast %157 : vector<16xf32> to vector<16x1xf32>
    %cst_78 = arith.constant 3.200000e+01 : f32
    %159 = vector.broadcast %cst_78 : f32 to vector<16x1xf32>
    %160 = arith.divf %158, %159 : vector<16x1xf32>
    %161 = vector.broadcast %160 : vector<16x1xf32> to vector<16x32xf32>
    %162 = arith.subf %154, %161 : vector<16x32xf32>
    %163 = arith.mulf %162, %162 : vector<16x32xf32>
    %cst_79 = arith.constant dense<0.000000e+00> : vector<16xf32>
    %164 = vector.multi_reduction <add>, %163, %cst_79 [1] : vector<16x32xf32> to vector<16xf32>
    %165 = vector.shape_cast %164 : vector<16xf32> to vector<16x1xf32>
    %cst_80 = arith.constant 3.200000e+01 : f32
    %166 = vector.broadcast %cst_80 : f32 to vector<16x1xf32>
    %167 = arith.divf %165, %166 : vector<16x1xf32>
    %168 = vector.broadcast %160 : vector<16x1xf32> to vector<16x32xf32>
    %169 = arith.subf %154, %168 : vector<16x32xf32>
    %cst_81 = arith.constant 9.99999997E-7 : f32
    %170 = vector.broadcast %cst_81 : f32 to vector<16x1xf32>
    %171 = arith.addf %167, %170 : vector<16x1xf32>
    %172 = math.rsqrt %171 : vector<16x1xf32>
    %173 = vector.broadcast %172 : vector<16x1xf32> to vector<16x32xf32>
    %174 = arith.mulf %169, %173 : vector<16x32xf32>
    %175 = vector.broadcast %155 : vector<1x32xf32> to vector<16x32xf32>
    %176 = arith.mulf %174, %175 : vector<16x32xf32>
    %177 = vector.broadcast %156 : vector<1x32xf32> to vector<16x32xf32>
    %178 = arith.addf %176, %177 : vector<16x32xf32>
    %c0_82 = arith.constant 0 : index
    %c0_83 = arith.constant 0 : index
    %179 = vector.load %arg20[%c0_82, %c0_83] : memref<32x64xf32, #tpu.memory_space<vmem>>, vector<32x64xf32>
    %cst_84 = arith.constant dense<0.000000e+00> : vector<16x64xf32>
    %180 = tpu.matmul %178, %179, %cst_84 {dimension_numbers = #tpu.dot_dimension_numbers<[1], [0], [0], [1], [0, 0, 1, 1], [], []>} : vector<16x32xf32>, vector<32x64xf32>, vector<16x64xf32> -> vector<16x64xf32>
    %c0_85 = arith.constant 0 : index
    %c0_86 = arith.constant 0 : index
    %181 = vector.load %arg21[%c0_85, %c0_86] : memref<1x64xf32, #tpu.memory_space<vmem>>, vector<1x64xf32>
    %182 = vector.broadcast %181 : vector<1x64xf32> to vector<16x64xf32>
    %183 = arith.addf %180, %182 : vector<16x64xf32>
    %cst_87 = arith.constant 0.000000e+00 : f32
    %184 = vector.broadcast %cst_87 : f32 to vector<16x64xf32>
    %185 = arith.maximumf %183, %184 : vector<16x64xf32>
    %c0_88 = arith.constant 0 : index
    %c0_89 = arith.constant 0 : index
    %186 = vector.load %arg22[%c0_88, %c0_89] : memref<64x16xf32, #tpu.memory_space<vmem>>, vector<64x16xf32>
    %cst_90 = arith.constant dense<0.000000e+00> : vector<16x16xf32>
    %187 = tpu.matmul %185, %186, %cst_90 {dimension_numbers = #tpu.dot_dimension_numbers<[1], [0], [0], [1], [0, 0, 1, 1], [], []>} : vector<16x64xf32>, vector<64x16xf32>, vector<16x16xf32> -> vector<16x16xf32>
    %c0_91 = arith.constant 0 : index
    %c0_92 = arith.constant 0 : index
    %188 = vector.load %arg23[%c0_91, %c0_92] : memref<1x16xf32, #tpu.memory_space<vmem>>, vector<1x16xf32>
    %189 = vector.broadcast %188 : vector<1x16xf32> to vector<16x16xf32>
    %190 = arith.addf %187, %189 : vector<16x16xf32>
    %c0_93 = arith.constant 0 : index
    %c0_94 = arith.constant 0 : index
    %191 = vector.load %arg24[%c0_93, %c0_94] : memref<1x16xf32, #tpu.memory_space<vmem>>, vector<1x16xf32>
    %c0_95 = arith.constant 0 : index
    %c0_96 = arith.constant 0 : index
    %192 = vector.load %arg25[%c0_95, %c0_96] : memref<1x16xf32, #tpu.memory_space<vmem>>, vector<1x16xf32>
    %cst_97 = arith.constant dense<0.000000e+00> : vector<16xf32>
    %193 = vector.multi_reduction <add>, %190, %cst_97 [1] : vector<16x16xf32> to vector<16xf32>
    %194 = vector.shape_cast %193 : vector<16xf32> to vector<16x1xf32>
    %cst_98 = arith.constant 1.600000e+01 : f32
    %195 = vector.broadcast %cst_98 : f32 to vector<16x1xf32>
    %196 = arith.divf %194, %195 : vector<16x1xf32>
    %197 = vector.broadcast %196 : vector<16x1xf32> to vector<16x16xf32>
    %198 = arith.subf %190, %197 : vector<16x16xf32>
    %199 = arith.mulf %198, %198 : vector<16x16xf32>
    %cst_99 = arith.constant dense<0.000000e+00> : vector<16xf32>
    %200 = vector.multi_reduction <add>, %199, %cst_99 [1] : vector<16x16xf32> to vector<16xf32>
    %201 = vector.shape_cast %200 : vector<16xf32> to vector<16x1xf32>
    %cst_100 = arith.constant 1.600000e+01 : f32
    %202 = vector.broadcast %cst_100 : f32 to vector<16x1xf32>
    %203 = arith.divf %201, %202 : vector<16x1xf32>
    %204 = vector.broadcast %196 : vector<16x1xf32> to vector<16x16xf32>
    %205 = arith.subf %190, %204 : vector<16x16xf32>
    %cst_101 = arith.constant 9.99999997E-7 : f32
    %206 = vector.broadcast %cst_101 : f32 to vector<16x1xf32>
    %207 = arith.addf %203, %206 : vector<16x1xf32>
    %208 = math.rsqrt %207 : vector<16x1xf32>
    %209 = vector.broadcast %208 : vector<16x1xf32> to vector<16x16xf32>
    %210 = arith.mulf %205, %209 : vector<16x16xf32>
    %211 = vector.broadcast %191 : vector<1x16xf32> to vector<16x16xf32>
    %212 = arith.mulf %210, %211 : vector<16x16xf32>
    %213 = vector.broadcast %192 : vector<1x16xf32> to vector<16x16xf32>
    %214 = arith.addf %212, %213 : vector<16x16xf32>
    %c0_102 = arith.constant 0 : index
    %c0_103 = arith.constant 0 : index
    %215 = vector.load %arg26[%c0_102, %c0_103] : memref<16x16xf32, #tpu.memory_space<vmem>>, vector<16x16xf32>
    tpu.vector_store %arg26[%c0_102, %c0_103], %214 {strides = array<i32>} : memref<16x16xf32, #tpu.memory_space<vmem>>, vector<16x16xf32>,
    return
  }
  func.func @transform_0(%arg0: i32) -> (i32, i32) {
    %c0_i32 = arith.constant 0 : i32
    %c0_i32_0 = arith.constant 0 : i32
    return %arg0, %c0_i32 : i32, i32
  }
  func.func @transform_1(%arg0: i32) -> (i32, i32, i32) {
    %c0_i32 = arith.constant 0 : i32
    %c0_i32_0 = arith.constant 0 : i32
    %c0_i32_1 = arith.constant 0 : i32
    %c0_i32_2 = arith.constant 0 : i32
    return %c0_i32, %c0_i32_0, %c0_i32_1 : i32, i32, i32
  }
  func.func @transform_2(%arg0: i32) -> (i32, i32, i32) {
    %c0_i32 = arith.constant 0 : i32
    %c0_i32_0 = arith.constant 0 : i32
    %c0_i32_1 = arith.constant 0 : i32
    %c0_i32_2 = arith.constant 0 : i32
    return %c0_i32, %c0_i32_0, %c0_i32_1 : i32, i32, i32
  }
  func.func @transform_3(%arg0: i32) -> (i32, i32, i32) {
    %c0_i32 = arith.constant 0 : i32
    %c0_i32_0 = arith.constant 0 : i32
    %c0_i32_1 = arith.constant 0 : i32
    %c0_i32_2 = arith.constant 0 : i32
    return %c0_i32, %c0_i32_0, %c0_i32_1 : i32, i32, i32
  }
  func.func @transform_4(%arg0: i32) -> (i32, i32, i32) {
    %c0_i32 = arith.constant 0 : i32
    %c0_i32_0 = arith.constant 0 : i32
    %c0_i32_1 = arith.constant 0 : i32
    %c0_i32_2 = arith.constant 0 : i32
    return %c0_i32, %c0_i32_0, %c0_i32_1 : i32, i32, i32
  }
  func.func @transform_5(%arg0: i32) -> (i32, i32) {
    %c0_i32 = arith.constant 0 : i32
    %c0_i32_0 = arith.constant 0 : i32
    %c0_i32_1 = arith.constant 0 : i32
    return %c0_i32, %c0_i32_0 : i32, i32
  }
  func.func @transform_6(%arg0: i32) -> (i32, i32) {
    %c0_i32 = arith.constant 0 : i32
    %c0_i32_0 = arith.constant 0 : i32
    %c0_i32_1 = arith.constant 0 : i32
    return %c0_i32, %c0_i32_0 : i32, i32
  }
  func.func @transform_7(%arg0: i32) -> (i32, i32) {
    %c0_i32 = arith.constant 0 : i32
    %c0_i32_0 = arith.constant 0 : i32
    %c0_i32_1 = arith.constant 0 : i32
    return %c0_i32, %c0_i32_0 : i32, i32
  }
  func.func @transform_8(%arg0: i32) -> (i32, i32) {
    %c0_i32 = arith.constant 0 : i32
    %c0_i32_0 = arith.constant 0 : i32
    %c0_i32_1 = arith.constant 0 : i32
    return %c0_i32, %c0_i32_0 : i32, i32
  }
  func.func @transform_9(%arg0: i32) -> (i32, i32) {
    %c0_i32 = arith.constant 0 : i32
    %c0_i32_0 = arith.constant 0 : i32
    %c0_i32_1 = arith.constant 0 : i32
    return %c0_i32, %c0_i32_0 : i32, i32
  }
  func.func @transform_10(%arg0: i32) -> (i32, i32) {
    %c0_i32 = arith.constant 0 : i32
    %c0_i32_0 = arith.constant 0 : i32
    %c0_i32_1 = arith.constant 0 : i32
    return %c0_i32, %c0_i32_0 : i32, i32
  }
  func.func @transform_11(%arg0: i32) -> (i32, i32) {
    %c0_i32 = arith.constant 0 : i32
    %c0_i32_0 = arith.constant 0 : i32
    %c0_i32_1 = arith.constant 0 : i32
    return %c0_i32, %c0_i32_0 : i32, i32
  }
  func.func @transform_12(%arg0: i32) -> (i32, i32) {
    %c0_i32 = arith.constant 0 : i32
    %c0_i32_0 = arith.constant 0 : i32
    %c0_i32_1 = arith.constant 0 : i32
    return %c0_i32, %c0_i32_0 : i32, i32
  }
  func.func @transform_13(%arg0: i32) -> (i32, i32, i32) {
    %c0_i32 = arith.constant 0 : i32
    %c0_i32_0 = arith.constant 0 : i32
    %c0_i32_1 = arith.constant 0 : i32
    %c0_i32_2 = arith.constant 0 : i32
    return %c0_i32, %c0_i32_0, %c0_i32_1 : i32, i32, i32
  }
  func.func @transform_14(%arg0: i32) -> (i32, i32, i32) {
    %c0_i32 = arith.constant 0 : i32
    %c0_i32_0 = arith.constant 0 : i32
    %c0_i32_1 = arith.constant 0 : i32
    %c0_i32_2 = arith.constant 0 : i32
    return %c0_i32, %c0_i32_0, %c0_i32_1 : i32, i32, i32
  }
  func.func @transform_15(%arg0: i32) -> (i32, i32, i32) {
    %c0_i32 = arith.constant 0 : i32
    %c0_i32_0 = arith.constant 0 : i32
    %c0_i32_1 = arith.constant 0 : i32
    %c0_i32_2 = arith.constant 0 : i32
    return %c0_i32, %c0_i32_0, %c0_i32_1 : i32, i32, i32
  }
  func.func @transform_16(%arg0: i32) -> (i32, i32, i32) {
    %c0_i32 = arith.constant 0 : i32
    %c0_i32_0 = arith.constant 0 : i32
    %c0_i32_1 = arith.constant 0 : i32
    %c0_i32_2 = arith.constant 0 : i32
    return %c0_i32, %c0_i32_0, %c0_i32_1 : i32, i32, i32
  }
  func.func @transform_17(%arg0: i32) -> (i32, i32) {
    %c0_i32 = arith.constant 0 : i32
    %c0_i32_0 = arith.constant 0 : i32
    %c0_i32_1 = arith.constant 0 : i32
    return %c0_i32, %c0_i32_0 : i32, i32
  }
  func.func @transform_18(%arg0: i32) -> (i32, i32) {
    %c0_i32 = arith.constant 0 : i32
    %c0_i32_0 = arith.constant 0 : i32
    %c0_i32_1 = arith.constant 0 : i32
    return %c0_i32, %c0_i32_0 : i32, i32
  }
  func.func @transform_19(%arg0: i32) -> (i32, i32) {
    %c0_i32 = arith.constant 0 : i32
    %c0_i32_0 = arith.constant 0 : i32
    %c0_i32_1 = arith.constant 0 : i32
    return %c0_i32, %c0_i32_0 : i32, i32
  }
  func.func @transform_20(%arg0: i32) -> (i32, i32) {
    %c0_i32 = arith.constant 0 : i32
    %c0_i32_0 = arith.constant 0 : i32
    %c0_i32_1 = arith.constant 0 : i32
    return %c0_i32, %c0_i32_0 : i32, i32
  }
  func.func @transform_21(%arg0: i32) -> (i32, i32) {
    %c0_i32 = arith.constant 0 : i32
    %c0_i32_0 = arith.constant 0 : i32
    %c0_i32_1 = arith.constant 0 : i32
    return %c0_i32, %c0_i32_0 : i32, i32
  }
  func.func @transform_22(%arg0: i32) -> (i32, i32) {
    %c0_i32 = arith.constant 0 : i32
    %c0_i32_0 = arith.constant 0 : i32
    %c0_i32_1 = arith.constant 0 : i32
    return %c0_i32, %c0_i32_0 : i32, i32
  }
  func.func @transform_23(%arg0: i32) -> (i32, i32) {
    %c0_i32 = arith.constant 0 : i32
    %c0_i32_0 = arith.constant 0 : i32
    %c0_i32_1 = arith.constant 0 : i32
    return %c0_i32, %c0_i32_0 : i32, i32
  }
  func.func @transform_24(%arg0: i32) -> (i32, i32) {
    %c0_i32 = arith.constant 0 : i32
    %c0_i32_0 = arith.constant 0 : i32
    %c0_i32_1 = arith.constant 0 : i32
    return %c0_i32, %c0_i32_0 : i32, i32
  }
  func.func @transform_25(%arg0: i32) -> (i32, i32) {
    %c0_i32 = arith.constant 0 : i32
    %c0_i32_0 = arith.constant 0 : i32
    return %arg0, %c0_i32 : i32, i32
  }
}

</mosaic_0001>

<bundles_post_ra>
// kernel: tpu_custom_call.1
= control target key start
LH: loop header
LB: loop body
LE: loop exit
PB: predicated region body
PF: predicated region fallthrough
CT: control target
= control target key end

     0   :  { %s10543_s0 = inlined_call_operand.vmem [shape: f32[16,16], index: 0, kind: input, shape index: {}]   ;;  %s10544_s1 = inlined_call_operand.vmem [shape: f32[4,16,8], index: 1, kind: input, shape index: {}]   ;;  %s10545_s2 = inlined_call_operand.vmem [shape: f32[4,16,8], index: 2, kind: input, shape index: {}]   ;;  %s10546_s3 = inlined_call_operand.vmem [shape: f32[4,16,8], index: 3, kind: input, shape index: {}]   ;;  %s10547_s4 = inlined_call_operand.vmem [shape: f32[4,8,32], index: 4, kind: input, shape index: {}]   ;;  %s10548_s5 = inlined_call_operand.vmem [shape: f32[1,32], index: 5, kind: input, shape index: {}]   ;;  %s10549_s6 = inlined_call_operand.vmem [shape: f32[1,32], index: 6, kind: input, shape index: {}]   ;;  %s10550_s7 = inlined_call_operand.vmem [shape: f32[32,64], index: 7, kind: input, shape index: {}]   ;;  %s10551_s8 = inlined_call_operand.vmem [shape: f32[1,64], index: 8, kind: input, shape index: {}]   ;;  %s10552_s9 = inlined_call_operand.vmem [shape: f32[64,32], index: 9, kind: input, shape index: {}]   ;;  %s10553_s10 = inlined_call_operand.vmem [shape: f32[1,32], index: 10, kind: input, shape index: {}]   ;;  %s10554_s11 = inlined_call_operand.vmem [shape: f32[1,32], index: 11, kind: input, shape index: {}]   ;;  %s10555_s12 = inlined_call_operand.vmem [shape: f32[1,32], index: 12, kind: input, shape index: {}]   ;;  %s10556_s13 = inlined_call_operand.vmem [shape: f32[4,32,8], index: 13, kind: input, shape index: {}]   ;;  %s10557_s14 = inlined_call_operand.vmem [shape: f32[4,32,8], index: 14, kind: input, shape index: {}]   ;;  %s10558_s15 = inlined_call_operand.vmem [shape: f32[4,32,8], index: 15, kind: input, shape index: {}]   ;;  %s10559_s16 = inlined_call_operand.vmem [shape: f32[4,8,32], index: 16, kind: input, shape index: {}]   ;;  %s10560_s17 = inlined_call_operand.vmem [shape: f32[1,32], index: 17, kind: input, shape index: {}]   ;;  %s10561_s18 = inlined_call_operand.vmem [shape: f32[1,32], index: 18, kind: input, shape index: {}]   ;;  %s10562_s19 = inlined_call_operand.vmem [shape: f32[32,64], index: 19, kind: input, shape index: {}]   ;;  %s10563_s20 = inlined_call_operand.vmem [shape: f32[1,64], index: 20, kind: input, shape index: {}]   ;;  %s10564_s21 = inlined_call_operand.vmem [shape: f32[64,16], index: 21, kind: input, shape index: {}]   ;;  %s10565_s22 = inlined_call_operand.vmem [shape: f32[1,16], index: 22, kind: input, shape index: {}]   ;;  %s10566_s23 = inlined_call_operand.vmem [shape: f32[1,16], index: 23, kind: input, shape index: {}]   ;;  %s10567_s24 = inlined_call_operand.vmem [shape: f32[1,16], index: 24, kind: input, shape index: {}]   ;;  %s10568_s25 = inlined_call_operand.hbm [shape: f32[16,16], index: 25, kind: output, shape index: {}]  }
   0x1   :  { %10576 = sst [smem:[#allocation5_spill]] %s10543_s0 }
   0x2   :  { %10577 = sst [smem:[#allocation6_spill]] %s10544_s1 }
   0x3   :  { %10578 = sst [smem:[#allocation7_spill]] %s10545_s2 }
   0x4   :  { %10579 = sst [smem:[#allocation8_spill]] %s10546_s3 }
   0x5   :  { %10580 = sst [smem:[#allocation9_spill]] %s10547_s4 }
   0x6   :  { %10581 = sst [smem:[#allocation10_spill]] %s10548_s5 }
   0x7   :  { %10582 = sst [smem:[#allocation11_spill]] %s10549_s6 }
   0x8   :  { %10583 = sst [smem:[#allocation12_spill]] %s10550_s7 }
   0x9   :  { %10584 = sst [smem:[#allocation13_spill]] %s10551_s8 }
   0xa   :  { %10585 = sst [smem:[#allocation14_spill]] %s10552_s9 }
   0xb   :  { %s10586_s6 = sld [smem:[#allocation6_spill]]  ;;  %v9449_v3 = vmov 0.0|0.0   ;;  %vm9450_vm0 = vmmov 0   ;;  %v9451_v8 = vmov 0.0   ;;  %s10587_s29 = sld [smem:[#allocation5_spill]]  ;;  %vm91_vm1 = vcmask 130048  }
   0xc   :  { %9075 = vmatprep.subr.bf16.mxu0 %v9449_v3  ;;  %9084 = vmatprep.subr.bf16.mxu1 %v9449_v3 }
   0xd   :  { %8347 = vmatprep.mubr.msk.f32.mxu0 %vm9450_vm0, %v9451_v8  ;;  %8368 = vmatprep.mubr.msk.f32.mxu1 %vm9450_vm0, %v9451_v8 }
  0x11   :  { %v83_v0 = vld [vmem:[%s10586_s6] sm:$0xff]  ;;  %v84_v1 = vld [vmem:[%s10586_s6 + $0x8] sm:$0xff]  ;;  %v89_v2 = vld [vmem:[%s10586_s6 + $0x30] sm:$0xff] }
  0x12   :  { %v9076_v4 = vpack.c.bf16 %v84_v1, %v83_v0  ;;  %v90_v5 = vld [vmem:[%s10586_s6 + $0x38] sm:$0xff]  ;;  %v85_v6 = vld [vmem:[%s10586_s6 + $0x10] sm:$0xff]  ;;  %v9612_v10 = vld [vmem:[%s10587_s29] sm:$0xff] }
  0x13   :  { %v9085_v7 = vpack.c.bf16 %v90_v5, %v89_v2  ;;  %v86_v9 = vld [vmem:[%s10586_s6 + $0x18] sm:$0xff]  ;;  %v87_v12 = vld [vmem:[%s10586_s6 + $0x20] sm:$0xff]  ;;  %v88_v13 = vld [vmem:[%s10586_s6 + $0x28] sm:$0xff] }
  0x14   :  { %9077 = vmatpush3.bf16.msra.mxu0 %v9076_v4  ;;  %v9079_v11 = vpack.c.bf16 %v86_v9, %v85_v6  ;;  %v9082_v14 = vpack.c.bf16 %v88_v13, %v87_v12 }
  0x15   :  { %9086 = vmatpush3.bf16.msra.mxu1 %v9085_v7  ;;  %9078 = vmatprep.subr.bf16.mxu0 %v9449_v3 }
  0x16   :  { %9090 = vmatprep.subr.bf16.mxu1 %v9449_v3 }
  0x17   :  { %8348 = vmatmul.mubr.msk.f32.vlgmr.msra.gmra.mrb[0].mxu0 %vm91_vm1, %v9612_v10 }
  0x18   :  { %8369 = vmatmul.mubr.msk.f32.vlgmr.msra.gmra.mrb[0].mxu1 %vm91_vm1, %v9612_v10  ;;  %9080 = vmatpush3.bf16.msra.mxu0 %v9079_v11 }
  0x19   :  { %30 = vsyncpa [#allocation3], 0  ;;  %9092 = vmatpush3.bf16.msra.mxu1 %v9079_v11  ;;  %8354 = vmatprep.mubr.msk.f32.mxu0 %vm9450_vm0, %v9451_v8  ;;  %v9631_v15 = vld [vmem:[%s10587_s29 + $0x8] sm:$0xff]  ;;  %s10588_s27 = sld [smem:[#allocation7_spill]]  ;;  %s10589_s28 = sld [smem:[#allocation8_spill]]  ;;  %vm1794_vm2 = vcmask 64512  }
  0x1a   :  { %8382 = vmatprep.mubr.msk.f32.mxu1 %vm9450_vm0, %v9451_v8  ;;  %9081 = vmatprep.subr.bf16.mxu0 %v9449_v3  ;;  %s10590_s5 = sld [smem:[#allocation9_spill]]  ;;  %vm3671_vm3 = vcmask 261120   ;;  %s10591_s6 = sld [smem:[#allocation12_spill]]  ;;  %vm3840_vm4 = vcmask 523264  }
  0x1b   :  { %8355 = vmatmul.mubr.msk.f32.vlgmr.msra.gmra.mrb[2].mxu0 %vm91_vm1, %v9612_v10  ;;  %9096 = vmatprep.subr.bf16.mxu1 %v9449_v3  ;;  %s10592_s2 = sld [smem:[#allocation14_spill]]  ;;  %s10593_s0 = sld [smem:[#allocation10_spill]] }
  0x1c   :  { %8383 = vmatmul.mubr.msk.f32.vlgmr.msra.gmra.mrb[2].mxu1 %vm91_vm1, %v9631_v15  ;;  %9083 = vmatpush3.bf16.msra.mxu0 %v9082_v14  ;;  %s10594_s7 = sld [smem:[#allocation11_spill]]  ;;  %s10595_s4 = sld [smem:[#allocation13_spill]] }
  0x1d   :  { %9098 = vmatpush3.bf16.msra.mxu1 %v9085_v7  ;;  %8361 = vmatprep.mubr.msk.f32.mxu0 %vm9450_vm0, %v9451_v8  ;;  %s9452_s9 = smov [#allocation2]  }
  0x1e   :  { %8396 = vmatprep.mubr.msk.f32.mxu1 %vm9450_vm0, %v9451_v8  ;;  %9087 = vmatprep.subr.bf16.mxu0 %v9449_v3 }
  0x1f   :  { %v660_v16 = vld [vmem:[%s10588_s27 + $0x10] sm:$0xff]  ;;  %v661_v17 = vld [vmem:[%s10588_s27 + $0x18] sm:$0xff]  ;;  %8362 = vmatmul.mubr.msk.f32.vlgmr.msra.gmra.mrb[4].mxu0 %vm91_vm1, %v9612_v10  ;;  %9102 = vmatprep.subr.bf16.mxu1 %v9449_v3  ;;  %v658_v22 = vld [vmem:[%s10588_s27] sm:$0xff] }
  0x20   :  { %v9103_v18 = vpack.c.bf16 %v661_v17, %v660_v16  ;;  %v664_v19 = vld [vmem:[%s10588_s27 + $0x30] sm:$0xff]  ;;  %v665_v20 = vld [vmem:[%s10588_s27 + $0x38] sm:$0xff]  ;;  %8397 = vmatmul.mubr.msk.f32.vlgmr.msra.gmra.mrb[4].mxu1 %vm91_vm1, %v9631_v15  ;;  %9089 = vmatpush3.bf16.msra.mxu0 %v9076_v4  ;;  %v659_v23 = vld [vmem:[%s10588_s27 + $0x8] sm:$0xff] }
  0x21   :  { %8375 = vmatprep.mubr.msk.f32.mxu0 %vm9450_vm0, %v9451_v8  ;;  %v9109_v21 = vpack.c.bf16 %v665_v20, %v664_v19  ;;  %8410 = vmatprep.mubr.msk.f32.mxu1 %vm9450_vm0, %v9451_v8  ;;  %v9100_v24 = vpack.c.bf16 %v659_v23, %v658_v22  ;;  %v662_v25 = vld [vmem:[%s10588_s27 + $0x20] sm:$0xff]  ;;  %v663_v26 = vld [vmem:[%s10588_s27 + $0x28] sm:$0xff]  ;;  %v1228_v28 = vld [vmem:[%s10589_s28 + $0x10] sm:$0xff] }
  0x22   :  { %9104 = vmatpush3.bf16.msra.mxu1 %v9103_v18  ;;  %9093 = vmatprep.subr.bf16.mxu0 %v9449_v3  ;;  %v9106_v27 = vpack.c.bf16 %v663_v26, %v662_v25  ;;  %v1229_v29 = vld [vmem:[%s10589_s28 + $0x18] sm:$0xff]  ;;  %v1232_v31 = vld [vmem:[%s10589_s28 + $0x30] sm:$0xff]  ;;  %v1226_v34 = vld [vmem:[%s10589_s28] sm:$0xff] }
  0x23   :  { %8376 = vmatmul.mubr.msk.f32.vlgmr.msra.gmra.mrb[6].mxu0 %vm91_vm1, %v9631_v15  ;;  %9108 = vmatprep.subr.bf16.mxu1 %v9449_v3  ;;  %v9127_v30 = vpack.c.bf16 %v1229_v29, %v1228_v28  ;;  %v1233_v32 = vld [vmem:[%s10589_s28 + $0x38] sm:$0xff]  ;;  %v1227_v35 = vld [vmem:[%s10589_s28 + $0x8] sm:$0xff]  ;;  %v1230_v37 = vld [vmem:[%s10589_s28 + $0x20] sm:$0xff] }
  0x24   :  { %9095 = vmatpush3.bf16.msra.mxu0 %v9082_v14  ;;  %8389 = vmatprep.mubr.msk.f32.mxu0 %vm9450_vm0, %v9451_v8  ;;  %v9133_v33 = vpack.c.bf16 %v1233_v32, %v1232_v31  ;;  %v9124_v36 = vpack.c.bf16 %v1227_v35, %v1226_v34  ;;  %v1231_v38 = vld [vmem:[%s10589_s28 + $0x28] sm:$0xff] }
  0x25   :  { %8411 = vmatmul.mubr.msk.f32.vlgmr.msra.gmra.mrb[6].mxu1 %vm91_vm1, %v9612_v10  ;;  %9099 = vmatprep.subr.bf16.mxu0 %v9449_v3  ;;  %v9130_v39 = vpack.c.bf16 %v1231_v38, %v1230_v37 }
  0x26   :  { %9110 = vmatpush3.bf16.msra.mxu1 %v9109_v21  ;;  %8424 = vmatprep.mubr.msk.f32.mxu1 %vm9450_vm0, %v9451_v8 }
  0x27   :  { %8390 = vmatmul.mubr.msk.f32.vlgmr.msra.gmra.mrb[8].mxu0 %vm91_vm1, %v9631_v15  ;;  %9114 = vmatprep.subr.bf16.mxu1 %v9449_v3 }
  0x28   :  { %9101 = vmatpush3.bf16.msra.mxu0 %v9100_v24  ;;  %8403 = vmatprep.mubr.msk.f32.mxu0 %vm9450_vm0, %v9451_v8 }
  0x29   :  { %8425 = vmatmul.mubr.msk.f32.vlgmr.msra.gmra.mrb[8].mxu1 %vm91_vm1, %v9612_v10  ;;  %9105 = vmatprep.subr.bf16.mxu0 %v9449_v3 }
  0x2a   :  { %9116 = vmatpush3.bf16.msra.mxu1 %v9103_v18  ;;  %8438 = vmatprep.mubr.msk.f32.mxu1 %vm9450_vm0, %v9451_v8 }
  0x2b   :  { %8404 = vmatmul.mubr.msk.f32.vlgmr.msra.gmra.mrb[10].mxu0 %vm91_vm1, %v9612_v10  ;;  %9120 = vmatprep.subr.bf16.mxu1 %v9449_v3 }
  0x2c   :  { %9107 = vmatpush3.bf16.msra.mxu0 %v9106_v27  ;;  %8417 = vmatprep.mubr.msk.f32.mxu0 %vm9450_vm0, %v9451_v8 }
  0x2d   :  { %8439 = vmatmul.mubr.msk.f32.vlgmr.msra.gmra.mrb[10].mxu1 %vm91_vm1, %v9631_v15  ;;  %9111 = vmatprep.subr.bf16.mxu0 %v9449_v3 }
  0x2e   :  { %9122 = vmatpush3.bf16.msra.mxu1 %v9109_v21  ;;  %8452 = vmatprep.mubr.msk.f32.mxu1 %vm9450_vm0, %v9451_v8 }
  0x2f   :  { %8418 = vmatmul.mubr.msk.f32.vlgmr.msra.gmra.mrb[12].mxu0 %vm91_vm1, %v9612_v10  ;;  %9126 = vmatprep.subr.bf16.mxu1 %v9449_v3 }
  0x30   :  { %9113 = vmatpush3.bf16.msra.mxu0 %v9100_v24  ;;  %8431 = vmatprep.mubr.msk.f32.mxu0 %vm9450_vm0, %v9451_v8 }
  0x31   :  { %8453 = vmatmul.mubr.msk.f32.vlgmr.msra.gmra.mrb[12].mxu1 %vm91_vm1, %v9631_v15  ;;  %9117 = vmatprep.subr.bf16.mxu0 %v9449_v3 }
  0x32   :  { %9128 = vmatpush3.bf16.msra.mxu1 %v9127_v30  ;;  %8466 = vmatprep.mubr.msk.f32.mxu1 %vm9450_vm0, %v9451_v8 }
  0x33   :  { %8432 = vmatmul.mubr.msk.f32.vlgmr.msra.gmra.mrb[14].mxu0 %vm91_vm1, %v9631_v15  ;;  %9132 = vmatprep.subr.bf16.mxu1 %v9449_v3 }
  0x34   :  { %9119 = vmatpush3.bf16.msra.mxu0 %v9106_v27  ;;  %8445 = vmatprep.mubr.msk.f32.mxu0 %vm9450_vm0, %v9451_v8 }
  0x35   :  { %8467 = vmatmul.mubr.msk.f32.vlgmr.msra.gmra.mrb[14].mxu1 %vm91_vm1, %v9612_v10  ;;  %9123 = vmatprep.subr.bf16.mxu0 %v9449_v3 }
  0x36   :  { %9134 = vmatpush3.bf16.msra.mxu1 %v9133_v33  ;;  %8480 = vmatprep.mubr.msk.f32.mxu1 %vm9450_vm0, %v9451_v8 }
  0x37   :  { %8446 = vmatmul.mubr.msk.f32.vlgmr.msra.gmra.mrb[16].mxu0 %vm91_vm1, %v9631_v15  ;;  %9138 = vmatprep.subr.bf16.mxu1 %v9449_v3 }
  0x38   :  { %8459 = vmatprep.mubr.msk.f32.mxu0 %vm9450_vm0, %v9451_v8  ;;  %9125 = vmatpush3.bf16.msra.mxu0 %v9124_v36 }
  0x39   :  { %8481 = vmatmul.mubr.msk.f32.vlgmr.msra.gmra.mrb[16].mxu1 %vm91_vm1, %v9612_v10  ;;  %9129 = vmatprep.subr.bf16.mxu0 %v9449_v3 }
  0x3a   :  { %9140 = vmatpush3.bf16.msra.mxu1 %v9127_v30  ;;  %8494 = vmatprep.mubr.msk.f32.mxu1 %vm9450_vm0, %v9451_v8 }
  0x3b   :  { %9144 = vmatprep.subr.bf16.mxu1 %v9449_v3  ;;  %8460 = vmatmul.mubr.msk.f32.vlgmr.msra.gmra.mrb[18].mxu0 %vm91_vm1, %v9612_v10 }
  0x3c   :  { %9131 = vmatpush3.bf16.msra.mxu0 %v9130_v39  ;;  %8473 = vmatprep.mubr.msk.f32.mxu0 %vm9450_vm0, %v9451_v8 }
  0x3d   :  { %8495 = vmatmul.mubr.msk.f32.vlgmr.msra.gmra.mrb[18].mxu1 %vm91_vm1, %v9631_v15  ;;  %9135 = vmatprep.subr.bf16.mxu0 %v9449_v3 }
  0x3e   :  { %9146 = vmatpush3.bf16.msra.mxu1 %v9133_v33  ;;  %8508 = vmatprep.mubr.msk.f32.mxu1 %vm9450_vm0, %v9451_v8 }
  0x3f   :  { %8516 = vmatprep.subr.mxu1 %v9451_v8  ;;  %8474 = vmatmul.mubr.msk.f32.vlgmr.msra.gmra.mrb[20].mxu0 %vm91_vm1, %v9612_v10 }
  0x40   :  { %9137 = vmatpush3.bf16.msra.mxu0 %v9124_v36  ;;  %8487 = vmatprep.mubr.msk.f32.mxu0 %vm9450_vm0, %v9451_v8 }
  0x41   :  { %8509 = vmatmul.mubr.msk.f32.vlgmr.msra.gmra.mrb[20].mxu1 %vm91_vm1, %v9631_v15  ;;  %9141 = vmatprep.subr.bf16.mxu0 %v9449_v3 }
  0x42   :  { %8518 = vmatprep.mubr.msk.f32.mxu1 %vm9450_vm0, %v9451_v8 }
  0x43   :  { %8488 = vmatmul.mubr.msk.f32.vlgmr.msra.gmra.mrb[22].mxu0 %vm91_vm1, %v9631_v15 }
  0x44   :  { %9143 = vmatpush3.bf16.msra.mxu0 %v9130_v39  ;;  %8501 = vmatprep.mubr.msk.f32.mxu0 %vm9450_vm0, %v9451_v8 }
  0x45   :  { %8511 = vmatprep.subr.mxu0 %v9451_v8 }
  0x47   :  { %8502 = vmatmul.mubr.msk.f32.vlgmr.msra.gmra.mrb[24].mxu0 %vm91_vm1, %v9631_v15 }
  0x48   :  { %8513 = vmatprep.mubr.msk.f32.mxu0 %vm9450_vm0, %v9451_v8 }
  0xea   :  { %v161_v40 = vpop.f32.mrb[0].mxu0 }
  0xeb   :  { %v8349_v41 = vpop.f32.mrb[1].mxu0  ;;  %v371_v42 = vpop.f32.mrb[0].mxu1 }
  0xec   :  { %v8370_v43 = vpop.f32.mrb[1].mxu1 }
  0xee   :  { %v231_v44 = vpop.f32.mrb[2].mxu0 }
  0xef   :  { %v8356_v45 = vpop.f32.mrb[3].mxu0  ;;  %v514_v46 = vpop.f32.mrb[2].mxu1 }
  0xf0   :  { %v8384_v47 = vpop.f32.mrb[3].mxu1 }
  0xf2   :  { %v301_v48 = vpop.f32.mrb[4].mxu0 }
  0xf3   :  { %v8363_v49 = vpop.f32.mrb[5].mxu0  ;;  %v654_v50 = vpop.f32.mrb[4].mxu1 }
  0xf4   :  { %v8398_v51 = vpop.f32.mrb[5].mxu1 }
  0xf6   :  { %v444_v52 = vpop.f32.mrb[6].mxu0 }
  0xf7   :  { %v8377_v54 = vpop.f32.mrb[7].mxu0 }
  0xf8   :  { %v802_v53 = vpop.f32.mrb[6].mxu1 }
  0xf9   :  { %8517 = vmatpush3.xpose.msk.msra.mxu1 %vm1794_vm2, %v802_v53  ;;  %v8412_v55 = vpop.f32.mrb[7].mxu1 }
  0xfa   :  { %8526 = vmatprep.subr.mxu1 %v9451_v8  ;;  %v584_v56 = vpop.f32.mrb[8].mxu0 }
  0xfb   :  { %v8391_v58 = vpop.f32.mrb[9].mxu0 }
  0xfc   :  { %v942_v57 = vpop.f32.mrb[8].mxu1  ;;  %8519 = vmatmul.mubr.msk.f32.vlgmr.msra.gmra.mrb[22].mxu1 %vm1794_vm2, %v231_v44 }
  0xfd   :  { %8527 = vmatpush3.xpose.msk.msra.mxu1 %vm1794_vm2, %v942_v57  ;;  %v8426_v59 = vpop.f32.mrb[9].mxu1  ;;  %8528 = vmatprep.mubr.msk.f32.mxu1 %vm9450_vm0, %v9451_v8 }
  0xfe   :  { %8536 = vmatprep.subr.mxu1 %v9451_v8  ;;  %v732_v60 = vpop.f32.mrb[10].mxu0 }
  0xff   :  { %v8405_v62 = vpop.f32.mrb[11].mxu0  ;;  %8512 = vmatpush3.xpose.msk.msra.mxu0 %vm1794_vm2, %v732_v60 }
 0x100   :  { %v1082_v61 = vpop.f32.mrb[10].mxu1  ;;  %8529 = vmatmul.mubr.msk.f32.vlgmr.msra.gmra.mrb[24].mxu1 %vm1794_vm2, %v371_v42  ;;  %8521 = vmatprep.subr.mxu0 %v9451_v8 }
 0x101   :  { %8537 = vmatpush3.xpose.msk.msra.mxu1 %vm1794_vm2, %v1082_v61  ;;  %v8440_v63 = vpop.f32.mrb[11].mxu1  ;;  %8538 = vmatprep.mubr.msk.f32.mxu1 %vm9450_vm0, %v9451_v8 }
 0x102   :  { %8546 = vmatprep.subr.mxu1 %v9451_v8  ;;  %v872_v0 = vpop.f32.mrb[12].mxu0  ;;  %8514 = vmatmul.mubr.msk.f32.vlgmr.msra.gmra.mrb[26].mxu0 %vm1794_vm2, %v161_v40 }
 0x103   :  { %v8419_v2 = vpop.f32.mrb[13].mxu0  ;;  %8522 = vmatpush3.xpose.msk.msra.mxu0 %vm1794_vm2, %v872_v0  ;;  %8523 = vmatprep.mubr.msk.f32.mxu0 %vm9450_vm0, %v9451_v8 }
 0x104   :  { %v1222_v1 = vpop.f32.mrb[12].mxu1  ;;  %8539 = vmatmul.mubr.msk.f32.vlgmr.msra.gmra.mrb[26].mxu1 %vm1794_vm2, %v514_v46  ;;  %8531 = vmatprep.subr.mxu0 %v9451_v8 }
 0x105   :  { %8547 = vmatpush3.xpose.msk.msra.mxu1 %vm1794_vm2, %v1222_v1  ;;  %v8454_v4 = vpop.f32.mrb[13].mxu1  ;;  %8548 = vmatprep.mubr.msk.f32.mxu1 %vm9450_vm0, %v9451_v8 }
 0x106   :  { %v1012_v5 = vpop.f32.mrb[14].mxu0  ;;  %8524 = vmatmul.mubr.msk.f32.vlgmr.msra.gmra.mrb[28].mxu0 %vm1794_vm2, %v301_v48  ;;  %8556 = vmatprep.subr.mxu1 %v9451_v8 }
 0x107   :  { %8532 = vmatpush3.xpose.msk.msra.mxu0 %vm1794_vm2, %v1012_v5  ;;  %v8433_v6 = vpop.f32.mrb[15].mxu0  ;;  %8533 = vmatprep.mubr.msk.f32.mxu0 %vm9450_vm0, %v9451_v8 }
 0x108   :  { %8549 = vmatmul.mubr.msk.f32.vlgmr.msra.gmra.mrb[28].mxu1 %vm1794_vm2, %v654_v50  ;;  %8541 = vmatprep.subr.mxu0 %v9451_v8  ;;  %v1370_v7 = vpop.f32.mrb[14].mxu1 }
 0x109   :  { %v8468_v9 = vpop.f32.mrb[15].mxu1  ;;  %8557 = vmatpush3.msra.mxu1 %v1370_v7  ;;  %8558 = vmatprep.mubr.msk.f32.mxu1 %vm9450_vm0, %v9451_v8 }
 0x10a   :  { %v1152_v10 = vpop.f32.mrb[16].mxu0  ;;  %8534 = vmatmul.mubr.msk.f32.vlgmr.msra.gmra.mrb[30].mxu0 %vm1794_vm2, %v444_v52  ;;  %8566 = vmatprep.subr.mxu1 %v9451_v8 }
 0x10b   :  { %8542 = vmatpush3.xpose.msk.msra.mxu0 %vm1794_vm2, %v1152_v10  ;;  %v8447_v11 = vpop.f32.mrb[17].mxu0  ;;  %8543 = vmatprep.mubr.msk.f32.mxu0 %vm9450_vm0, %v9451_v8 }
 0x10c   :  { %8551 = vmatprep.subr.mxu0 %v9451_v8  ;;  %v9831_v12 = vpop.f32.mrb[16].mxu1 }
 0x10d   :  { %v8482_v13 = vpop.f32.mrb[17].mxu1 }
 0x10e   :  { %8544 = vmatmul.mubr.msk.f32.vlgmr.msra.gmra.mrb[32].mxu0 %vm1794_vm2, %v584_v56  ;;  %v1300_v18 = vpop.f32.mrb[18].mxu0 }
 0x10f   :  { %8553 = vmatprep.mubr.msk.f32.mxu0 %vm9450_vm0, %v9451_v8  ;;  %v8461_v19 = vpop.f32.mrb[19].mxu0  ;;  %8552 = vmatpush3.msra.mxu0 %v1300_v18 }
 0x110   :  { %v9836_v14 = vpop.f32.mrb[18].mxu1  ;;  %8561 = vmatprep.subr.mxu0 %v9451_v8 }
 0x111   :  { %v8496_v15 = vpop.f32.mrb[19].mxu1 }
 0x112   :  { %v9841_v20 = vpop.f32.mrb[20].mxu0 }
 0x113   :  { %v8475_v21 = vpop.f32.mrb[21].mxu0 }
 0x114   :  { %v9838_v16 = vpop.f32.mrb[20].mxu1 }
 0x115   :  { %v8510_v17 = vpop.f32.mrb[21].mxu1 }
 0x116   :  { %v9843_v22 = vpop.f32.mrb[22].mxu0 }
 0x117   :  { %v8489_v23 = vpop.f32.mrb[23].mxu0 }
 0x11a   :  { %v9845_v24 = vpop.f32.mrb[24].mxu0 }
 0x11b   :  { %v8503_v25 = vpop.f32.mrb[25].mxu0 }
 0x1cf   :  { %v1943_v26 = vpop.f32.mrb[22].mxu1 }
 0x1d0   :  { %v8520_v27 = vpop.f32.mrb[23].mxu1  ;;  %v2404_v35 = vmul.f32 0.35355338, %v1943_v26 }
 0x1d2   :  { %v2414_v43 = vsel %vm1794_vm2, %v2404_v35, -inf }
 0x1d3   :  { %v2095_v28 = vpop.f32.mrb[24].mxu1 }
 0x1d4   :  { %v8530_v29 = vpop.f32.mrb[25].mxu1  ;;  %v2406_v42 = vmul.f32 0.35355338, %v2095_v28 }
 0x1d5   :  { %v1867_v30 = vpop.f32.mrb[26].mxu0 }
 0x1d6   :  { %v2403_v31 = vmul.f32 0.35355338, %v1867_v30  ;;  %v8515_v33 = vpop.f32.mrb[27].mxu0  ;;  %v2420_v49 = vsel %vm1794_vm2, %v2406_v42, -inf }
 0x1d7   :  { %v2247_v32 = vpop.f32.mrb[26].mxu1 }
 0x1d8   :  { %v8540_v34 = vpop.f32.mrb[27].mxu1  ;;  %v2411_v36 = vsel %vm1794_vm2, %v2403_v31, -inf  ;;  %v2408_v48 = vmul.f32 0.35355338, %v2247_v32 }
 0x1d9   :  { %2412 = vmax.xlane.f32.xlu0 %v2411_v36  ;;  %v2019_v37 = vpop.f32.mrb[28].mxu0 }
 0x1da   :  { %v2405_v39 = vmul.f32 0.35355338, %v2019_v37  ;;  %v8525_v40 = vpop.f32.mrb[29].mxu0  ;;  %v2426_v55 = vsel %vm1794_vm2, %v2408_v48, -inf }
 0x1db   :  { %v2399_v38 = vpop.f32.mrb[28].mxu1 }
 0x1dc   :  { %v8550_v41 = vpop.f32.mrb[29].mxu1  ;;  %v2417_v44 = vsel %vm1794_vm2, %v2405_v39, -inf  ;;  %v2410_v54 = vmul.f32 0.35355338, %v2399_v38 }
 0x1dd   :  { %2415 = vmax.xlane.f32.xlu0 %v2414_v43  ;;  %2418 = vmax.xlane.f32.xlu1 %v2417_v44  ;;  %v2171_v45 = vpop.f32.mrb[30].mxu0 }
 0x1de   :  { %v2407_v46 = vmul.f32 0.35355338, %v2171_v45  ;;  %v8535_v47 = vpop.f32.mrb[31].mxu0  ;;  %v2432_v57 = vsel %vm1794_vm2, %v2410_v54, -inf }
 0x1e0   :  { %v2423_v50 = vsel %vm1794_vm2, %v2407_v46, -inf }
 0x1e1   :  { %2421 = vmax.xlane.f32.xlu1 %v2420_v49  ;;  %2424 = vmax.xlane.f32.xlu0 %v2423_v50  ;;  %v2323_v51 = vpop.f32.mrb[32].mxu0 }
 0x1e2   :  { %v2409_v52 = vmul.f32 0.35355338, %v2323_v51  ;;  %v8545_v53 = vpop.f32.mrb[33].mxu0 }
 0x1e4   :  { %v2429_v56 = vsel %vm1794_vm2, %v2409_v52, -inf }
 0x1e5   :  { %2427 = vmax.xlane.f32.xlu1 %v2426_v55  ;;  %2430 = vmax.xlane.f32.xlu0 %v2429_v56 }
 0x1e9   :  { %2433 = vmax.xlane.f32.xlu1 %v2432_v57 }
 0x266   :  { %v2413_v58 = vpop.xlane.xlu0 %2412 }
 0x267   :  { %v2435_v59 = vsub.f32 %v2403_v31, %v2413_v58 }
 0x269   :  { %v2443_v60 = vmul.f32 1.442695, %v2435_v59 }
 0x26a   :  { %v2416_v61 = vpop.xlane.xlu0 %2415  ;;  %v2419_v62 = vpop.xlane.xlu1 %2418 }
 0x26b   :  { %9345 = vpow2.f32 %v2443_v60  ;;  %v2436_v63 = vsub.f32 %v2404_v35, %v2416_v61  ;;  %v2437_v0 = vsub.f32 %v2405_v39, %v2419_v62  ;;  %v3085_v62 = vld [vmem:[%s10590_s5 + $0x10] sm:$0xff] }
 0x26d   :  { %v2445_v1 = vmul.f32 1.442695, %v2436_v63  ;;  %v2447_v2 = vmul.f32 1.442695, %v2437_v0 }
 0x26e   :  { %v2422_v4 = vpop.xlane.xlu1 %2421  ;;  %v2425_v5 = vpop.xlane.xlu0 %2424 }
 0x26f   :  { %9347 = vpow2.f32 %v2445_v1  ;;  %v2438_v6 = vsub.f32 %v2406_v42, %v2422_v4  ;;  %v2439_v7 = vsub.f32 %v2407_v46, %v2425_v5  ;;  %v3086_v1 = vld [vmem:[%s10590_s5 + $0x18] sm:$0xff] }
 0x270   :  { %9349 = vpow2.f32 %v2447_v2 }
 0x271   :  { %v2449_v9 = vmul.f32 1.442695, %v2438_v6  ;;  %v2451_v10 = vmul.f32 1.442695, %v2439_v7 }
 0x272   :  { %v2428_v11 = vpop.xlane.xlu1 %2427  ;;  %v2431_v13 = vpop.xlane.xlu0 %2430 }
 0x273   :  { %9351 = vpow2.f32 %v2449_v9  ;;  %v2440_v15 = vsub.f32 %v2408_v48, %v2428_v11  ;;  %v2441_v17 = vsub.f32 %v2409_v52, %v2431_v13 }
 0x274   :  { %9353 = vpow2.f32 %v2451_v10 }
 0x275   :  { %v9346_v18 = vpop.eup %9345  ;;  %v2453_v19 = vmul.f32 1.442695, %v2440_v15  ;;  %v2455_v21 = vmul.f32 1.442695, %v2441_v17 }
 0x276   :  { %v2434_v23 = vpop.xlane.xlu1 %2433  ;;  %v2459_v25 = vsel %vm1794_vm2, %v9346_v18, 0.0 }
 0x277   :  { %9355 = vpow2.f32 %v2453_v19  ;;  %v2442_v26 = vsub.f32 %v2410_v54, %v2434_v23  ;;  %2460 = vadd.xlane.f32.xlu0 %v2459_v25 }
 0x278   :  { %9357 = vpow2.f32 %v2455_v21 }
 0x279   :  { %v9348_v27 = vpop.eup %9347  ;;  %v2457_v28 = vmul.f32 1.442695, %v2442_v26 }
 0x27a   :  { %v9350_v29 = vpop.eup %9349  ;;  %v2462_v30 = vsel %vm1794_vm2, %v9348_v27, 0.0 }
 0x27b   :  { %9359 = vpow2.f32 %v2457_v28  ;;  %2463 = vadd.xlane.f32.xlu1 %v2462_v30  ;;  %v2465_v31 = vsel %vm1794_vm2, %v9350_v29, 0.0 }
 0x27c   :  { %2466 = vadd.xlane.f32.xlu0 %v2465_v31 }
 0x27d   :  { %v9352_v32 = vpop.eup %9351 }
 0x27e   :  { %v9354_v33 = vpop.eup %9353  ;;  %v2468_v34 = vsel %vm1794_vm2, %v9352_v32, 0.0 }
 0x27f   :  { %2469 = vadd.xlane.f32.xlu1 %v2468_v34  ;;  %v2471_v35 = vsel %vm1794_vm2, %v9354_v33, 0.0 }
 0x280   :  { %2472 = vadd.xlane.f32.xlu0 %v2471_v35 }
 0x281   :  { %v9356_v36 = vpop.eup %9355 }
 0x282   :  { %v9358_v37 = vpop.eup %9357  ;;  %v2474_v38 = vsel %vm1794_vm2, %v9356_v36, 0.0 }
 0x283   :  { %2475 = vadd.xlane.f32.xlu1 %v2474_v38  ;;  %v2477_v39 = vsel %vm1794_vm2, %v9358_v37, 0.0 }
 0x284   :  { %2478 = vadd.xlane.f32.xlu0 %v2477_v39 }
 0x285   :  { %v9360_v40 = vpop.eup %9359 }
 0x286   :  { %v2480_v41 = vsel %vm1794_vm2, %v9360_v40, 0.0 }
 0x287   :  { %2481 = vadd.xlane.f32.xlu1 %v2480_v41 }
 0x304   :  { %v2461_v42 = vpop.xlane.xlu0 %2460 }
 0x305   :  { %9361 = vrcp.f32 %v2461_v42 }
 0x308   :  { %v2464_v43 = vpop.xlane.xlu1 %2463 }
 0x309   :  { %9363 = vrcp.f32 %v2464_v43  ;;  %v2467_v44 = vpop.xlane.xlu0 %2466 }
 0x30a   :  { %9365 = vrcp.f32 %v2467_v44 }
 0x30c   :  { %v2470_v45 = vpop.xlane.xlu1 %2469 }
 0x30d   :  { %9367 = vrcp.f32 %v2470_v45  ;;  %v2473_v46 = vpop.xlane.xlu0 %2472 }
 0x30e   :  { %9369 = vrcp.f32 %v2473_v46 }
 0x30f   :  { %v9362_v47 = vpop.eup %9361 }
 0x310   :  { %v2491_v48 = vmul.f32 %v9362_v47, %v9346_v18  ;;  %v2476_v49 = vpop.xlane.xlu1 %2475 }
 0x311   :  { %9371 = vrcp.f32 %v2476_v49  ;;  %v2479_v50 = vpop.xlane.xlu0 %2478 }
 0x312   :  { %9373 = vrcp.f32 %v2479_v50  ;;  %8554 = vmatmul.mubr.msk.f32.vlgmr.msra.gmra.mrb[34].mxu0 %vm1794_vm2, %v2491_v48 }
 0x313   :  { %v9364_v51 = vpop.eup %9363  ;;  %8562 = vmatpush3.msra.mxu0 %v9841_v20  ;;  %8563 = vmatprep.mubr.msk.f32.mxu0 %vm9450_vm0, %v9451_v8 }
 0x314   :  { %v9366_v52 = vpop.eup %9365  ;;  %v2492_v53 = vmul.f32 %v9364_v51, %v9348_v27  ;;  %v2482_v54 = vpop.xlane.xlu1 %2481  ;;  %8571 = vmatprep.subr.mxu0 %v9451_v8 }
 0x315   :  { %v2493_v55 = vmul.f32 %v9366_v52, %v9350_v29  ;;  %9375 = vrcp.f32 %v2482_v54 }
 0x316   :  { %8559 = vmatmul.mubr.msk.f32.vlgmr.msra.gmra.mrb[30].mxu1 %vm1794_vm2, %v2492_v53 }
 0x317   :  { %v9368_v56 = vpop.eup %9367  ;;  %8564 = vmatmul.mubr.msk.f32.vlgmr.msra.gmra.mrb[36].mxu0 %vm1794_vm2, %v2493_v55  ;;  %8567 = vmatpush3.msra.mxu1 %v9831_v12 }
 0x318   :  { %v9370_v57 = vpop.eup %9369  ;;  %v2494_v58 = vmul.f32 %v9368_v56, %v9352_v32  ;;  %8572 = vmatpush3.msra.mxu0 %v9843_v22  ;;  %8568 = vmatprep.mubr.msk.f32.mxu1 %vm9450_vm0, %v9451_v8 }
 0x319   :  { %v2495_v20 = vmul.f32 %v9370_v57, %v9354_v33  ;;  %8573 = vmatprep.mubr.msk.f32.mxu0 %vm9450_vm0, %v9451_v8  ;;  %8576 = vmatprep.subr.mxu1 %v9451_v8 }
 0x31a   :  { %8581 = vmatprep.subr.mxu0 %v9451_v8  ;;  %8569 = vmatmul.mubr.msk.f32.vlgmr.msra.gmra.mrb[32].mxu1 %vm1794_vm2, %v2494_v58 }
 0x31b   :  { %v9372_v59 = vpop.eup %9371  ;;  %8574 = vmatmul.mubr.msk.f32.vlgmr.msra.gmra.mrb[38].mxu0 %vm1794_vm2, %v2495_v20  ;;  %8577 = vmatpush3.msra.mxu1 %v9836_v14 }
 0x31c   :  { %v9374_v12 = vpop.eup %9373  ;;  %v2496_v22 = vmul.f32 %v9372_v59, %v9356_v36  ;;  %8582 = vmatpush3.msra.mxu0 %v9845_v24  ;;  %8578 = vmatprep.mubr.msk.f32.mxu1 %vm9450_vm0, %v9451_v8  ;;  %v3083_v24 = vld [vmem:[%s10590_s5] sm:$0xff] }
 0x31d   :  { %v2497_v60 = vmul.f32 %v9374_v12, %v9358_v37  ;;  %8583 = vmatprep.mubr.msk.f32.mxu0 %vm9450_vm0, %v9451_v8  ;;  %8586 = vmatprep.subr.mxu1 %v9451_v8 }
 0x31e   :  { %8579 = vmatmul.mubr.msk.f32.vlgmr.msra.gmra.mrb[34].mxu1 %vm1794_vm2, %v2496_v22  ;;  %8591 = vmatprep.subr.mxu0 %v9451_v8 }
 0x31f   :  { %v9376_v61 = vpop.eup %9375  ;;  %8584 = vmatmul.mubr.msk.f32.vlgmr.msra.gmra.mrb[40].mxu0 %vm1794_vm2, %v2497_v60  ;;  %8587 = vmatpush3.msra.mxu1 %v9838_v16  ;;  %v3084_v16 = vld [vmem:[%s10590_s5 + $0x8] sm:$0xff]  ;;  %s7880_s5 = sshll.u32 %s9452_s9, 4  ;;  %s7881_s5 = int_to_ptr.vmem [resolvable:$true] %s7880_s5 }
 0x320   :  { %v2498_v14 = vmul.f32 %v9376_v61, %v9360_v40  ;;  %8588 = vmatprep.mubr.msk.f32.mxu1 %vm9450_vm0, %v9451_v8  ;;  %8593 = vmatprep.mubr.msk.f32.mxu0 %vm9450_vm0, %v9451_v8  ;;  %p9430_p1 = scmp.lt.s32.totalorder %s7881_s5, %s7881_s5 }
 0x321   :  { %8596 = vmatprep.subr.mxu1 %v9451_v8  ;;  %8592 = vmatpush3.msra.mxu0 %v3083_v24 }
 0x322   :  { %8589 = vmatmul.mubr.msk.f32.vlgmr.msra.gmra.mrb[36].mxu1 %vm1794_vm2, %v2498_v14  ;;  %8601 = vmatprep.subr.mxu0 %v9451_v8 }
 0x323   :  { %8598 = vmatprep.mubr.msk.f32.mxu1 %vm9450_vm0, %v9451_v8  ;;  %8597 = vmatpush3.msra.mxu1 %v3084_v16 }
 0x324   :  { %8606 = vmatprep.subr.mxu1 %v9451_v8 }
 0x3e5   :  { %v2568_v63 = vpop.f32.mrb[34].mxu0 }
 0x3e6   :  { %v8555_v0 = vpop.f32.mrb[35].mxu0  ;;  %8594 = vmatmul.mubr.msk.f32.vlgmr.msra.gmra.mrb[42].mxu0 %vm1794_vm2, %v2568_v63  ;;  %v3733_v63 = vld [vmem:[%s10591_s6 + $0x10] sm:$0xff] }
 0x3e7   :  { %8602 = vmatpush3.msra.mxu0 %v3085_v62  ;;  %8603 = vmatprep.mubr.msk.f32.mxu0 %vm9450_vm0, %v9451_v8  ;;  %v3734_v0 = vld [vmem:[%s10591_s6 + $0x18] sm:$0xff] }
 0x3e8   :  { %8611 = vmatprep.subr.mxu0 %v9451_v8 }
 0x3e9   :  { %v2641_v2 = vpop.f32.mrb[30].mxu1 }
 0x3ea   :  { %v2714_v4 = vpop.f32.mrb[36].mxu0  ;;  %v8560_v5 = vpop.f32.mrb[31].mxu1  ;;  %8599 = vmatmul.mubr.msk.f32.vlgmr.msra.gmra.mrb[38].mxu1 %vm1794_vm2, %v2641_v2  ;;  %v3825_v2 = vld [vmem:[%s10592_s2] sm:$0xff] }
 0x3eb   :  { %v8565_v6 = vpop.f32.mrb[37].mxu0  ;;  %8604 = vmatmul.mubr.msk.f32.vlgmr.msra.gmra.mrb[44].mxu0 %vm1794_vm2, %v2714_v4  ;;  %8607 = vmatpush3.msra.mxu1 %v3086_v1  ;;  %v3826_v4 = vld [vmem:[%s10592_s2 + $0x8] sm:$0xff]  ;;  %v3827_v5 = vld [vmem:[%s10592_s2 + $0x10] sm:$0xff] }
 0x3ec   :  { %8608 = vmatprep.mubr.msk.f32.mxu1 %vm9450_vm0, %v9451_v8  ;;  %8612 = vmatpush3.msra.mxu0 %v3083_v24  ;;  %v3731_v24 = vld [vmem:[%s10591_s6] sm:$0xff]  ;;  %v9155_v6 = vpack.c.bf16 %v3826_v4, %v3825_v2  ;;  %v3978_v2 = vld [vmem:[%s10556_s13 + $0x50] sm:$0xff] }
 0x3ed   :  { %v2787_v7 = vpop.f32.mrb[32].mxu1  ;;  %8613 = vmatprep.mubr.msk.f32.mxu0 %vm9450_vm0, %v9451_v8  ;;  %8616 = vmatprep.subr.mxu1 %v9451_v8 }
 0x3ee   :  { %v2860_v9 = vpop.f32.mrb[38].mxu0  ;;  %v8570_v10 = vpop.f32.mrb[33].mxu1  ;;  %8609 = vmatmul.mubr.msk.f32.vlgmr.msra.gmra.mrb[40].mxu1 %vm1794_vm2, %v2787_v7  ;;  %8621 = vmatprep.subr.mxu0 %v9451_v8  ;;  %v3828_v7 = vld [vmem:[%s10592_s2 + $0x18] sm:$0xff] }
 0x3ef   :  { %v8575_v11 = vpop.f32.mrb[39].mxu0  ;;  %8614 = vmatmul.mubr.msk.f32.vlgmr.msra.gmra.mrb[46].mxu0 %vm1794_vm2, %v2860_v9  ;;  %8617 = vmatpush3.msra.mxu1 %v3084_v16  ;;  %v3732_v16 = vld [vmem:[%s10591_s6 + $0x8] sm:$0xff]  ;;  %v9159_v9 = vpack.c.bf16 %v3828_v7, %v3827_v5  ;;  %v3829_v10 = vld [vmem:[%s10592_s2 + $0x20] sm:$0xff]  ;;  %v3979_v5 = vld [vmem:[%s10556_s13 + $0x58] sm:$0xff] }
 0x3f0   :  { %8618 = vmatprep.mubr.msk.f32.mxu1 %vm9450_vm0, %v9451_v8  ;;  %8622 = vmatpush3.msra.mxu0 %v3085_v62  ;;  %v9147_v62 = vpack.c.bf16 %v3732_v16, %v3731_v24  ;;  %v3830_v11 = vld [vmem:[%s10592_s2 + $0x28] sm:$0xff]  ;;  %v3976_v24 = vld [vmem:[%s10556_s13 + $0x40] sm:$0xff] }
 0x3f1   :  { %v2933_v13 = vpop.f32.mrb[34].mxu1  ;;  %8623 = vmatprep.mubr.msk.f32.mxu0 %vm9450_vm0, %v9451_v8  ;;  %8626 = vmatprep.subr.mxu1 %v9451_v8 }
 0x3f2   :  { %v3006_v15 = vpop.f32.mrb[40].mxu0  ;;  %v8580_v17 = vpop.f32.mrb[35].mxu1  ;;  %8619 = vmatmul.mubr.msk.f32.vlgmr.msra.gmra.mrb[42].mxu1 %vm1794_vm2, %v2933_v13  ;;  %9148 = vmatprep.subr.bf16.mxu0 %v9147_v62  ;;  %v9163_v13 = vpack.c.bf16 %v3830_v11, %v3829_v10 }
 0x3f3   :  { %v8585_v18 = vpop.f32.mrb[41].mxu0  ;;  %8624 = vmatmul.mubr.msk.f32.vlgmr.msra.gmra.mrb[48].mxu0 %vm1794_vm2, %v3006_v15  ;;  %8627 = vmatpush3.msra.mxu1 %v3086_v1  ;;  %v9151_v1 = vpack.c.bf16 %v3734_v0, %v3733_v63  ;;  %v3970_v0 = vld [vmem:[%s10556_s13 + $0x10] sm:$0xff] }
 0x3f4   :  { %8628 = vmatprep.mubr.msk.f32.mxu1 %vm9450_vm0, %v9451_v8  ;;  %9150 = vmatpush3.bf16.msra.mxu0 %v9147_v62  ;;  %v3977_v62 = vld [vmem:[%s10556_s13 + $0x48] sm:$0xff] }
 0x3f5   :  { %v3079_v19 = vpop.f32.mrb[36].mxu1  ;;  %9152 = vmatprep.subr.bf16.mxu0 %v9151_v1  ;;  %9156 = vmatprep.subr.bf16.mxu1 %v9155_v6  ;;  %v9184_v63 = vpack.c.bf16 %v3977_v62, %v3976_v24  ;;  %v5126_v24 = vld [vmem:[%s10558_s15] sm:$0xff] }
 0x3f6   :  { %v8590_v21 = vpop.f32.mrb[37].mxu1  ;;  %8629 = vmatmul.mubr.msk.f32.vlgmr.msra.gmra.mrb[44].mxu1 %vm1794_vm2, %v3079_v19 }
 0x3f7   :  { %9158 = vmatpush3.bf16.msra.mxu1 %v9155_v6  ;;  %v9187_v6 = vpack.c.bf16 %v3979_v5, %v3978_v2  ;;  %v5134_v2 = vld [vmem:[%s10558_s15 + $0x40] sm:$0xff] }
 0x3f8   :  { %9154 = vmatpush3.bf16.msra.mxu0 %v9151_v1  ;;  %9160 = vmatprep.subr.bf16.mxu1 %v9159_v9  ;;  %v3971_v1 = vld [vmem:[%s10556_s13 + $0x18] sm:$0xff] }
 0x3f9   :  { %9171 = vmatprep.subr.bf16.mxu0 %v9449_v3  ;;  %v9175_v4 = vpack.c.bf16 %v3971_v1, %v3970_v0  ;;  %v5129_v0 = vld [vmem:[%s10558_s15 + $0x18] sm:$0xff] }
 0x3fb   :  { %9162 = vmatpush3.bf16.msra.mxu1 %v9159_v9 }
 0x3fc   :  { %9164 = vmatprep.subr.bf16.mxu1 %v9163_v13 }
 0x3ff   :  { %9166 = vmatpush3.bf16.msra.mxu1 %v9163_v13 }
 0x4b9   :  { %v3156_v23 = vpop.f32.mrb[42].mxu0 }
 0x4ba   :  { %v8595_v25 = vpop.f32.mrb[43].mxu0  ;;  %v3672_v27 = vsel %vm3671_vm3, %v3156_v23, 0.0 }
 0x4bd   :  { %v3229_v26 = vpop.f32.mrb[38].mxu1 }
 0x4be   :  { %v3673_v28 = vsel %vm3671_vm3, %v3229_v26, 0.0  ;;  %v3302_v29 = vpop.f32.mrb[44].mxu0  ;;  %v8600_v30 = vpop.f32.mrb[39].mxu1  ;;  %v7947_v26 = vld [vmem:[%s10593_s0] ss:$0 sm:$0xff]  ;;  %s9425_s0 = scalar_lea.vmem %s7881_s5, 256 }
 0x4bf   :  { %v3674_v31 = vadd.f32 %v3673_v28, %v3672_v27  ;;  %v8605_v32 = vpop.f32.mrb[45].mxu0  ;;  %v3675_v33 = vsel %vm3671_vm3, %v3302_v29, 0.0  ;;  %v7948_v28 = vld [vmem:[%s10594_s7] ss:$0 sm:$0xff]  ;;  %p9426_p0 = scmp.ne.s32.totalorder %s7881_s5, %s9425_s0  ;;  %p9431_p2 = scmp.lt.s32.totalorder %s9425_s0, %s9425_s0 }
 0x4c1   :  { %v3676_v34 = vadd.f32 %v3675_v33, %v3674_v31  ;;  %v3375_v35 = vpop.f32.mrb[40].mxu1  ;;  %p9432_p3 = por %p9431_p2, %p9430_p1 }
 0x4c2   :  { %v3677_v36 = vsel %vm3671_vm3, %v3375_v35, 0.0  ;;  %v3448_v37 = vpop.f32.mrb[46].mxu0  ;;  %v8610_v38 = vpop.f32.mrb[41].mxu1  ;;  %v3831_v35 = vld [vmem:[%s10592_s2 + $0x30] sm:$0xff] }
 0x4c3   :  { %v3678_v39 = vadd.f32 %v3677_v36, %v3676_v34  ;;  %v8615_v40 = vpop.f32.mrb[47].mxu0  ;;  %v3679_v43 = vsel %vm3671_vm3, %v3448_v37, 0.0  ;;  %v3832_v36 = vld [vmem:[%s10592_s2 + $0x38] sm:$0xff]  ;;  %v7949_v38 = vld [vmem:[%s10595_s4] ss:$0 sm:$0xff]  ;;  %p9433_p4 = pnand %p9432_p3, %p9426_p0 }
 0x4c4   :  { %v9167_v37 = vpack.c.bf16 %v3832_v36, %v3831_v35  ;;  %v3980_v35 = vld [vmem:[%s10556_s13 + $0x60] sm:$0xff]  ;;  %v3981_v36 = vld [vmem:[%s10556_s13 + $0x68] sm:$0xff] }
 0x4c5   :  { %v3521_v41 = vpop.f32.mrb[42].mxu1  ;;  %v3688_v42 = vsel %vm3671_vm3, %v3678_v39, 0.0 }
 0x4c6   :  { %v3680_v44 = vsel %vm3671_vm3, %v3521_v41, 0.0  ;;  %v3594_v45 = vpop.f32.mrb[48].mxu0  ;;  %v8620_v46 = vpop.f32.mrb[43].mxu1  ;;  %3689 = vadd.xlane.f32.xlu0 %v3688_v42  ;;  %9168 = vmatprep.subr.bf16.mxu1 %v9167_v37 }
 0x4c7   :  { %v3681_v47 = vadd.f32 %v3680_v44, %v3679_v43  ;;  %v8625_v48 = vpop.f32.mrb[49].mxu0  ;;  %v3682_v49 = vsel %vm3671_vm3, %v3594_v45, 0.0  ;;  %9170 = vmatpush3.bf16.msra.mxu1 %v9167_v37  ;;  %v7952_v45 = vld [vmem:[%s10553_s10] ss:$0 sm:$0xff]  ;;  %v9190_v37 = vpack.c.bf16 %v3981_v36, %v3980_v35 }
 0x4c8   :  { %9183 = vmatprep.subr.bf16.mxu1 %v9449_v3 }
 0x4c9   :  { %v3683_v50 = vadd.f32 %v3682_v49, %v3681_v47  ;;  %v3667_v51 = vpop.f32.mrb[44].mxu1 }
 0x4ca   :  { %v3684_v52 = vsel %vm3671_vm3, %v3667_v51, 0.0  ;;  %v8630_v53 = vpop.f32.mrb[45].mxu1 }
 0x4cb   :  { %v3685_v54 = vadd.f32 %v3684_v52, %v3683_v50 }
 0x4cd   :  { %v3691_v55 = vsel %vm3671_vm3, %v3685_v54, 0.0 }
 0x4ce   :  { %3692 = vadd.xlane.f32.xlu1 %v3691_v55 }
 0x553   :  { %v3690_v56 = vpop.xlane.xlu0 %3689 }
 0x554   :  { %v3695_v57 = vmul.f32 0.03125, %v3690_v56 }
 0x556   :  { %v3697_v58 = vsub.f32 %v3678_v39, %v3695_v57 }
 0x558   :  { %v3699_v20 = vmul.f32 %v3697_v58, %v3697_v58 }
 0x55a   :  { %v3701_v59 = vsel %vm3671_vm3, %v3699_v20, 0.0 }
 0x55b   :  { %3702 = vadd.xlane.f32.xlu0 %v3701_v59  ;;  %v3693_v12 = vpop.xlane.xlu1 %3692 }
 0x55c   :  { %v3696_v22 = vmul.f32 0.03125, %v3693_v12 }
 0x55e   :  { %v3698_v60 = vsub.f32 %v3685_v54, %v3696_v22 }
 0x560   :  { %v3700_v61 = vmul.f32 %v3698_v60, %v3698_v60 }
 0x562   :  { %v3704_v14 = vsel %vm3671_vm3, %v3700_v61, 0.0  ;;  %v3968_v61 = vld [vmem:[%s10556_s13] sm:$0xff] }
 0x563   :  { %3705 = vadd.xlane.f32.xlu1 %v3704_v14  ;;  %v3969_v14 = vld [vmem:[%s10556_s13 + $0x8] sm:$0xff] }
 0x564   :  { %v9172_v16 = vpack.c.bf16 %v3969_v14, %v3968_v61  ;;  %v4565_v61 = vld [vmem:[%s10557_s14 + $0x78] sm:$0xff] }
 0x5e8   :  { %v3703_v15 = vpop.xlane.xlu0 %3702 }
 0x5e9   :  { %v3707_v17 = vmul.f32 0.03125, %v3703_v15 }
 0x5eb   :  { %v3709_v18 = vadd.f32 1e-06, %v3707_v17 }
 0x5ed   :  { %9377 = vrsqrt.f32 %v3709_v18  ;;  %v7955_v18 = vld [vmem:[%s10554_s11] ss:$0 sm:$0xff] }
 0x5f0   :  { %v3706_v19 = vpop.xlane.xlu1 %3705 }
 0x5f1   :  { %v3708_v21 = vmul.f32 0.03125, %v3706_v19 }
 0x5f3   :  { %v3710_v23 = vadd.f32 1e-06, %v3708_v21  ;;  %v3972_v21 = vld [vmem:[%s10556_s13 + $0x20] sm:$0xff] }
 0x5f5   :  { %9379 = vrsqrt.f32 %v3710_v23  ;;  %v3973_v23 = vld [vmem:[%s10556_s13 + $0x28] sm:$0xff] }
 0x5f7   :  { %v9378_v25 = vpop.eup %9377 }
 0x5f8   :  { %v3713_v27 = vmul.f32 %v9378_v25, %v3697_v58 }
 0x5fa   :  { %v3721_v29 = vmul.f32 %v7947_v26, %v3713_v27 }
 0x5fc   :  { %v3729_v30 = vadd.f32 %v7948_v28, %v3721_v29 }
 0x5fe   :  { %8639 = vmatprep.mubr.msk.f32.mxu0 %vm3671_vm3, %v3729_v30 }
 0x5ff   :  { %v9380_v31 = vpop.eup %9379 }
 0x600   :  { %v3714_v32 = vmul.f32 %v9380_v31, %v3698_v60  ;;  %v3974_v31 = vld [vmem:[%s10556_s13 + $0x30] sm:$0xff] }
 0x602   :  { %v3722_v33 = vmul.f32 %v7947_v26, %v3714_v32  ;;  %v7956_v26 = vld [vmem:[%s10555_s12] ss:$0 sm:$0xff]  ;;  %v3975_v32 = vld [vmem:[%s10556_s13 + $0x38] sm:$0xff] }
 0x604   :  { %v3730_v34 = vadd.f32 %v7948_v28, %v3722_v33  ;;  %v9178_v28 = vpack.c.bf16 %v3973_v23, %v3972_v21  ;;  %v9181_v33 = vpack.c.bf16 %v3975_v32, %v3974_v31  ;;  %v5139_v21 = vld [vmem:[%s10558_s15 + $0x68] sm:$0xff] }
 0x606   :  { %8640 = vmatmul.mubr.msk.f32.vlgmr.msra.gmra.mrb[50].mxu0 %vm3671_vm3, %v3730_v34 }
 0x607   :  { %8669 = vmatprep.mubr.msk.f32.mxu0 %vm9450_vm0, %v9451_v8  ;;  %9173 = vmatpush3.bf16.msra.mxu0 %v9172_v16 }
 0x608   :  { %9174 = vmatprep.subr.bf16.mxu0 %v9449_v3 }
 0x60b   :  { %9176 = vmatpush3.bf16.msra.mxu0 %v9175_v4 }
 0x60c   :  { %9177 = vmatprep.subr.bf16.mxu0 %v9449_v3 }
 0x6d9   :  { %v8641_v39 = vpop.f32.mrb[50].mxu0 }
 0x6da   :  { %v3820_v40 = vadd.f32 %v8641_v39, %v7949_v38  ;;  %v3814_v41 = vpop.f32.mrb[51].mxu0  ;;  %v3982_v39 = vld [vmem:[%s10556_s13 + $0x70] sm:$0xff] }
 0x6db   :  { %v3815_v42 = vadd.f32 %v7949_v38, %v3814_v41 }
 0x6dc   :  { %v3824_v44 = vmax.f32 %v3820_v40, 0.0  ;;  %v3983_v40 = vld [vmem:[%s10556_s13 + $0x78] sm:$0xff] }
 0x6dd   :  { %v3823_v43 = vmax.f32 %v3815_v42, 0.0  ;;  %v9193_v41 = vpack.c.bf16 %v3983_v40, %v3982_v39  ;;  %v4550_v42 = vld [vmem:[%s10557_s14] sm:$0xff] }
 0x6df   :  { %8658 = vmatprep.mubr.msk.f32.mxu1 %vm3840_vm4, %v3823_v43  ;;  %v4551_v43 = vld [vmem:[%s10557_s14 + $0x8] sm:$0xff] }
 0x6e0   :  { %8659 = vmatmul.mubr.msk.f32.vlgmr.msra.gmra.mrb[46].mxu1 %vm3840_vm4, %v3824_v44  ;;  %v9220_v44 = vpack.c.bf16 %v4551_v43, %v4550_v42 }
 0x6e1   :  { %8691 = vmatprep.mubr.msk.f32.mxu1 %vm9450_vm0, %v9451_v8  ;;  %9185 = vmatpush3.bf16.msra.mxu1 %v9184_v63 }
 0x6e2   :  { %9186 = vmatprep.subr.bf16.mxu1 %v9449_v3 }
 0x6e5   :  { %9188 = vmatpush3.bf16.msra.mxu1 %v9187_v6 }
 0x6e6   :  { %9195 = vmatprep.subr.bf16.mxu1 %v9449_v3 }
 0x7b3   :  { %v8660_v46 = vpop.f32.mrb[46].mxu1 }
 0x7b4   :  { %v3919_v47 = vadd.f32 %v8660_v46, %v7952_v45  ;;  %v3913_v48 = vpop.f32.mrb[47].mxu1  ;;  %v4553_v46 = vld [vmem:[%s10557_s14 + $0x18] sm:$0xff] }
 0x7b5   :  { %v3914_v49 = vadd.f32 %v7952_v45, %v3913_v48  ;;  %v4552_v45 = vld [vmem:[%s10557_s14 + $0x10] sm:$0xff]  ;;  %v4558_v48 = vld [vmem:[%s10557_s14 + $0x40] sm:$0xff] }
 0x7b6   :  { %v3923_v50 = vadd.f32 %v3919_v47, %v3730_v34  ;;  %v9223_v47 = vpack.c.bf16 %v4553_v46, %v4552_v45 }
 0x7b7   :  { %v3922_v51 = vadd.f32 %v3914_v49, %v3729_v30  ;;  %v4559_v49 = vld [vmem:[%s10557_s14 + $0x48] sm:$0xff] }
 0x7b8   :  { %v3929_v52 = vsel %vm3671_vm3, %v3923_v50, 0.0 }
 0x7b9   :  { %3930 = vadd.xlane.f32.xlu1 %v3929_v52  ;;  %v3926_v53 = vsel %vm3671_vm3, %v3922_v51, 0.0  ;;  %v4561_v52 = vld [vmem:[%s10557_s14 + $0x58] sm:$0xff] }
 0x7ba   :  { %3927 = vadd.xlane.f32.xlu0 %v3926_v53 }
 0x846   :  { %v3931_v54 = vpop.xlane.xlu1 %3930 }
 0x847   :  { %v3933_v55 = vmul.f32 0.03125, %v3931_v54  ;;  %v3928_v56 = vpop.xlane.xlu0 %3927  ;;  %v4554_v54 = vld [vmem:[%s10557_s14 + $0x20] sm:$0xff] }
 0x848   :  { %v3932_v57 = vmul.f32 0.03125, %v3928_v56 }
 0x849   :  { %v3935_v58 = vsub.f32 %v3923_v50, %v3933_v55  ;;  %v9232_v50 = vpack.c.bf16 %v4559_v49, %v4558_v48  ;;  %v4555_v55 = vld [vmem:[%s10557_s14 + $0x28] sm:$0xff] }
 0x84a   :  { %v3934_v20 = vsub.f32 %v3922_v51, %v3932_v57  ;;  %v4560_v51 = vld [vmem:[%s10557_s14 + $0x50] sm:$0xff]  ;;  %v9226_v56 = vpack.c.bf16 %v4555_v55, %v4554_v54 }
 0x84b   :  { %v3937_v59 = vmul.f32 %v3935_v58, %v3935_v58  ;;  %v9235_v53 = vpack.c.bf16 %v4561_v52, %v4560_v51  ;;  %v4556_v57 = vld [vmem:[%s10557_s14 + $0x30] sm:$0xff] }
 0x84c   :  { %v3936_v12 = vmul.f32 %v3934_v20, %v3934_v20 }
 0x84d   :  { %v3941_v22 = vsel %vm3671_vm3, %v3937_v59, 0.0  ;;  %v4562_v59 = vld [vmem:[%s10557_s14 + $0x60] sm:$0xff] }
 0x84e   :  { %3942 = vadd.xlane.f32.xlu1 %v3941_v22  ;;  %v3938_v60 = vsel %vm3671_vm3, %v3936_v12, 0.0  ;;  %v4563_v12 = vld [vmem:[%s10557_s14 + $0x68] sm:$0xff] }
 0x84f   :  { %3939 = vadd.xlane.f32.xlu0 %v3938_v60  ;;  %v9238_v22 = vpack.c.bf16 %v4563_v12, %v4562_v59  ;;  %v4564_v60 = vld [vmem:[%s10557_s14 + $0x70] sm:$0xff] }
 0x850   :  { %v9241_v14 = vpack.c.bf16 %v4565_v61, %v4564_v60 }
 0x8db   :  { %v3943_v7 = vpop.xlane.xlu1 %3942 }
 0x8dc   :  { %v3945_v9 = vmul.f32 0.03125, %v3943_v7  ;;  %v3940_v10 = vpop.xlane.xlu0 %3939  ;;  %v5137_v7 = vld [vmem:[%s10558_s15 + $0x58] sm:$0xff] }
 0x8dd   :  { %v3944_v11 = vmul.f32 0.03125, %v3940_v10  ;;  %v5130_v10 = vld [vmem:[%s10558_s15 + $0x20] sm:$0xff] }
 0x8de   :  { %v3947_v13 = vadd.f32 1e-06, %v3945_v9 }
 0x8df   :  { %v3946_v15 = vadd.f32 1e-06, %v3944_v11  ;;  %v5131_v11 = vld [vmem:[%s10558_s15 + $0x28] sm:$0xff] }
 0x8e1   :  { %9381 = vrsqrt.f32 %v3946_v15  ;;  %v5132_v15 = vld [vmem:[%s10558_s15 + $0x30] sm:$0xff] }
 0x8e2   :  { %9383 = vrsqrt.f32 %v3947_v13  ;;  %v9274_v13 = vpack.c.bf16 %v5131_v11, %v5130_v10 }
 0x8eb   :  { %v9382_v17 = vpop.eup %9381 }
 0x8ec   :  { %v3950_v19 = vmul.f32 %v9382_v17, %v3934_v20  ;;  %v9384_v25 = vpop.eup %9383  ;;  %v5133_v17 = vld [vmem:[%s10558_s15 + $0x38] sm:$0xff] }
 0x8ed   :  { %v3951_v29 = vmul.f32 %v9384_v25, %v3935_v58  ;;  %v4557_v58 = vld [vmem:[%s10557_s14 + $0x38] sm:$0xff]  ;;  %v5140_v25 = vld [vmem:[%s10558_s15 + $0x70] sm:$0xff] }
 0x8ee   :  { %v3958_v27 = vmul.f32 %v7955_v18, %v3950_v19  ;;  %v9229_v20 = vpack.c.bf16 %v4557_v58, %v4556_v57  ;;  %v5138_v19 = vld [vmem:[%s10558_s15 + $0x60] sm:$0xff] }
 0x8ef   :  { %v3959_v34 = vmul.f32 %v7955_v18, %v3951_v29  ;;  %v9277_v18 = vpack.c.bf16 %v5133_v17, %v5132_v15  ;;  %v9286_v23 = vpack.c.bf16 %v5139_v21, %v5138_v19 }
 0x8f0   :  { %v10051_v30 = vadd.f32 %v7956_v26, %v3958_v27 }
 0x8f1   :  { %v10075_v38 = vadd.f32 %v7956_v26, %v3959_v34  ;;  %v5141_v26 = vld [vmem:[%s10558_s15 + $0x78] sm:$0xff] }
 0x8f2   :  { %8670 = vmatmul.mubr.msk.f32.vlgmr.msra.gmra.mrb[52].mxu0 %vm3671_vm3, %v10051_v30  ;;  %8692 = vmatmul.mubr.msk.f32.vlgmr.msra.gmra.mrb[48].mxu1 %vm3671_vm3, %v10051_v30  ;;  %v9289_v27 = vpack.c.bf16 %v5141_v26, %v5140_v25 }
 0x8f3   :  { %9179 = vmatpush3.bf16.msra.mxu0 %v9178_v28  ;;  %9197 = vmatpush3.bf16.msra.mxu1 %v9172_v16  ;;  %v5127_v16 = vld [vmem:[%s10558_s15 + $0x8] sm:$0xff] }
 0x8f4   :  { %9180 = vmatprep.subr.bf16.mxu0 %v9449_v3  ;;  %9198 = vmatprep.subr.bf16.mxu1 %v9449_v3  ;;  %v9268_v62 = vpack.c.bf16 %v5127_v16, %v5126_v24 }
 0x8f5   :  { %8680 = vmatprep.mubr.msk.f32.mxu0 %vm9450_vm0, %v9451_v8  ;;  %8713 = vmatprep.mubr.msk.f32.mxu1 %vm9450_vm0, %v9451_v8 }
 0x8f7   :  { %9182 = vmatpush3.bf16.msra.mxu0 %v9181_v33  ;;  %9200 = vmatpush3.bf16.msra.mxu1 %v9175_v4  ;;  %v5135_v4 = vld [vmem:[%s10558_s15 + $0x48] sm:$0xff] }
 0x8f8   :  { %9189 = vmatprep.subr.bf16.mxu0 %v9449_v3  ;;  %9207 = vmatprep.subr.bf16.mxu1 %v9449_v3  ;;  %v9280_v5 = vpack.c.bf16 %v5135_v4, %v5134_v2 }
 0x8fa   :  { %8681 = vmatmul.mubr.msk.f32.vlgmr.msra.gmra.mrb[54].mxu0 %vm3671_vm3, %v10051_v30  ;;  %8714 = vmatmul.mubr.msk.f32.vlgmr.msra.gmra.mrb[50].mxu1 %vm3671_vm3, %v10075_v38 }
 0x8fb   :  { %9191 = vmatpush3.bf16.msra.mxu0 %v9190_v37  ;;  %9209 = vmatpush3.bf16.msra.mxu1 %v9184_v63  ;;  %v5128_v63 = vld [vmem:[%s10558_s15 + $0x10] sm:$0xff] }
 0x8fc   :  { %9192 = vmatprep.subr.bf16.mxu0 %v9449_v3  ;;  %9210 = vmatprep.subr.bf16.mxu1 %v9449_v3  ;;  %v9271_v1 = vpack.c.bf16 %v5129_v0, %v5128_v63 }
 0x8fd   :  { %8702 = vmatprep.mubr.msk.f32.mxu0 %vm9450_vm0, %v9451_v8  ;;  %8735 = vmatprep.mubr.msk.f32.mxu1 %vm9450_vm0, %v9451_v8 }
 0x8ff   :  { %9194 = vmatpush3.bf16.msra.mxu0 %v9193_v41  ;;  %9212 = vmatpush3.bf16.msra.mxu1 %v9187_v6  ;;  %v5136_v6 = vld [vmem:[%s10558_s15 + $0x50] sm:$0xff] }
 0x900   :  { %9201 = vmatprep.subr.bf16.mxu0 %v9449_v3  ;;  %9219 = vmatprep.subr.bf16.mxu1 %v9449_v3  ;;  %v9283_v9 = vpack.c.bf16 %v5137_v7, %v5136_v6 }
 0x902   :  { %8703 = vmatmul.mubr.msk.f32.vlgmr.msra.gmra.mrb[56].mxu0 %vm3671_vm3, %v10051_v30  ;;  %8736 = vmatmul.mubr.msk.f32.vlgmr.msra.gmra.mrb[52].mxu1 %vm3671_vm3, %v10075_v38 }
 0x903   :  { %9203 = vmatpush3.bf16.msra.mxu0 %v9178_v28  ;;  %9221 = vmatpush3.bf16.msra.mxu1 %v9220_v44 }
 0x904   :  { %9204 = vmatprep.subr.bf16.mxu0 %v9449_v3  ;;  %9222 = vmatprep.subr.bf16.mxu1 %v9449_v3 }
 0x905   :  { %8724 = vmatprep.mubr.msk.f32.mxu0 %vm9450_vm0, %v9451_v8  ;;  %8757 = vmatprep.mubr.msk.f32.mxu1 %vm9450_vm0, %v9451_v8 }
 0x907   :  { %9206 = vmatpush3.bf16.msra.mxu0 %v9181_v33  ;;  %9224 = vmatpush3.bf16.msra.mxu1 %v9223_v47 }
 0x908   :  { %9213 = vmatprep.subr.bf16.mxu0 %v9449_v3  ;;  %9231 = vmatprep.subr.bf16.mxu1 %v9449_v3 }
 0x90a   :  { %8725 = vmatmul.mubr.msk.f32.vlgmr.msra.gmra.mrb[58].mxu0 %vm3671_vm3, %v10075_v38  ;;  %8758 = vmatmul.mubr.msk.f32.vlgmr.msra.gmra.mrb[54].mxu1 %vm3671_vm3, %v10051_v30 }
 0x90b   :  { %9215 = vmatpush3.bf16.msra.mxu0 %v9190_v37  ;;  %9233 = vmatpush3.bf16.msra.mxu1 %v9232_v50 }
 0x90c   :  { %9216 = vmatprep.subr.bf16.mxu0 %v9449_v3  ;;  %9234 = vmatprep.subr.bf16.mxu1 %v9449_v3 }
 0x90d   :  { %8746 = vmatprep.mubr.msk.f32.mxu0 %vm9450_vm0, %v9451_v8  ;;  %8779 = vmatprep.mubr.msk.f32.mxu1 %vm9450_vm0, %v9451_v8 }
 0x90f   :  { %9218 = vmatpush3.bf16.msra.mxu0 %v9193_v41  ;;  %9236 = vmatpush3.bf16.msra.mxu1 %v9235_v53 }
 0x910   :  { %9225 = vmatprep.subr.bf16.mxu0 %v9449_v3  ;;  %9243 = vmatprep.subr.bf16.mxu1 %v9449_v3 }
 0x912   :  { %8747 = vmatmul.mubr.msk.f32.vlgmr.msra.gmra.mrb[60].mxu0 %vm3671_vm3, %v10075_v38  ;;  %8780 = vmatmul.mubr.msk.f32.vlgmr.msra.gmra.mrb[56].mxu1 %vm3671_vm3, %v10051_v30 }
 0x913   :  { %9227 = vmatpush3.bf16.msra.mxu0 %v9226_v56  ;;  %9245 = vmatpush3.bf16.msra.mxu1 %v9220_v44 }
 0x914   :  { %9228 = vmatprep.subr.bf16.mxu0 %v9449_v3  ;;  %9246 = vmatprep.subr.bf16.mxu1 %v9449_v3 }
 0x915   :  { %8768 = vmatprep.mubr.msk.f32.mxu0 %vm9450_vm0, %v9451_v8  ;;  %8801 = vmatprep.mubr.msk.f32.mxu1 %vm9450_vm0, %v9451_v8 }
 0x917   :  { %9230 = vmatpush3.bf16.msra.mxu0 %v9229_v20  ;;  %9248 = vmatpush3.bf16.msra.mxu1 %v9223_v47 }
 0x918   :  { %9237 = vmatprep.subr.bf16.mxu0 %v9449_v3  ;;  %9255 = vmatprep.subr.bf16.mxu1 %v9449_v3 }
 0x91a   :  { %8769 = vmatmul.mubr.msk.f32.vlgmr.msra.gmra.mrb[62].mxu0 %vm3671_vm3, %v10051_v30  ;;  %8802 = vmatmul.mubr.msk.f32.vlgmr.msra.gmra.mrb[58].mxu1 %vm3671_vm3, %v10075_v38 }
 0x91b   :  { %9239 = vmatpush3.bf16.msra.mxu0 %v9238_v22  ;;  %9257 = vmatpush3.bf16.msra.mxu1 %v9232_v50 }
 0x91c   :  { %9240 = vmatprep.subr.bf16.mxu0 %v9449_v3  ;;  %9258 = vmatprep.subr.bf16.mxu1 %v9449_v3 }
 0x91d   :  { %8790 = vmatprep.mubr.msk.f32.mxu0 %vm9450_vm0, %v9451_v8  ;;  %8823 = vmatprep.mubr.msk.f32.mxu1 %vm9450_vm0, %v9451_v8 }
 0x91f   :  { %9242 = vmatpush3.bf16.msra.mxu0 %v9241_v14  ;;  %9260 = vmatpush3.bf16.msra.mxu1 %v9235_v53 }
 0x920   :  { %9249 = vmatprep.subr.bf16.mxu0 %v9449_v3  ;;  %9267 = vmatprep.subr.bf16.mxu1 %v9449_v3 }
 0x922   :  { %8791 = vmatmul.mubr.msk.f32.vlgmr.msra.gmra.mrb[64].mxu0 %vm3671_vm3, %v10051_v30  ;;  %8824 = vmatmul.mubr.msk.f32.vlgmr.msra.gmra.mrb[60].mxu1 %vm3671_vm3, %v10075_v38 }
 0x923   :  { %9251 = vmatpush3.bf16.msra.mxu0 %v9226_v56  ;;  %9269 = vmatpush3.bf16.msra.mxu1 %v9268_v62 }
 0x924   :  { %9252 = vmatprep.subr.bf16.mxu0 %v9449_v3  ;;  %9270 = vmatprep.subr.bf16.mxu1 %v9449_v3 }
 0x925   :  { %8812 = vmatprep.mubr.msk.f32.mxu0 %vm9450_vm0, %v9451_v8  ;;  %8845 = vmatprep.mubr.msk.f32.mxu1 %vm9450_vm0, %v9451_v8 }
 0x927   :  { %9254 = vmatpush3.bf16.msra.mxu0 %v9229_v20  ;;  %9272 = vmatpush3.bf16.msra.mxu1 %v9271_v1 }
 0x928   :  { %9261 = vmatprep.subr.bf16.mxu0 %v9449_v3  ;;  %9279 = vmatprep.subr.bf16.mxu1 %v9449_v3 }
 0x92a   :  { %8813 = vmatmul.mubr.msk.f32.vlgmr.msra.gmra.mrb[66].mxu0 %vm3671_vm3, %v10075_v38  ;;  %8846 = vmatmul.mubr.msk.f32.vlgmr.msra.gmra.mrb[62].mxu1 %vm3671_vm3, %v10051_v30 }
 0x92b   :  { %9263 = vmatpush3.bf16.msra.mxu0 %v9238_v22  ;;  %9281 = vmatpush3.bf16.msra.mxu1 %v9280_v5 }
 0x92c   :  { %9264 = vmatprep.subr.bf16.mxu0 %v9449_v3  ;;  %9282 = vmatprep.subr.bf16.mxu1 %v9449_v3 }
 0x92d   :  { %8834 = vmatprep.mubr.msk.f32.mxu0 %vm9450_vm0, %v9451_v8  ;;  %8867 = vmatprep.mubr.msk.f32.mxu1 %vm9450_vm0, %v9451_v8 }
 0x92f   :  { %9266 = vmatpush3.bf16.msra.mxu0 %v9241_v14  ;;  %9284 = vmatpush3.bf16.msra.mxu1 %v9283_v9 }
 0x930   :  { %9273 = vmatprep.subr.bf16.mxu0 %v9449_v3  ;;  %9291 = vmatprep.subr.bf16.mxu1 %v9449_v3 }
 0x932   :  { %8835 = vmatmul.mubr.msk.f32.vlgmr.msra.gmra.mrb[68].mxu0 %vm3671_vm3, %v10075_v38  ;;  %8868 = vmatmul.mubr.msk.f32.vlgmr.msra.gmra.mrb[64].mxu1 %vm3671_vm3, %v10051_v30 }
 0x933   :  { %9275 = vmatpush3.bf16.msra.mxu0 %v9274_v13  ;;  %9293 = vmatpush3.bf16.msra.mxu1 %v9268_v62 }
 0x934   :  { %9276 = vmatprep.subr.bf16.mxu0 %v9449_v3  ;;  %9294 = vmatprep.subr.bf16.mxu1 %v9449_v3 }
 0x935   :  { %8856 = vmatprep.mubr.msk.f32.mxu0 %vm9450_vm0, %v9451_v8  ;;  %8889 = vmatprep.mubr.msk.f32.mxu1 %vm9450_vm0, %v9451_v8 }
 0x937   :  { %9278 = vmatpush3.bf16.msra.mxu0 %v9277_v18  ;;  %9296 = vmatpush3.bf16.msra.mxu1 %v9271_v1 }
 0x938   :  { %9285 = vmatprep.subr.bf16.mxu0 %v9449_v3  ;;  %9303 = vmatprep.subr.bf16.mxu1 %v9449_v3 }
 0x93a   :  { %8857 = vmatmul.mubr.msk.f32.vlgmr.msra.gmra.mrb[70].mxu0 %vm3671_vm3, %v10051_v30  ;;  %8890 = vmatmul.mubr.msk.f32.vlgmr.msra.gmra.mrb[66].mxu1 %vm3671_vm3, %v10075_v38 }
 0x93b   :  { %9287 = vmatpush3.bf16.msra.mxu0 %v9286_v23  ;;  %9305 = vmatpush3.bf16.msra.mxu1 %v9280_v5 }
 0x93c   :  { %9288 = vmatprep.subr.bf16.mxu0 %v9449_v3  ;;  %9306 = vmatprep.subr.bf16.mxu1 %v9449_v3 }
 0x93d   :  { %8878 = vmatprep.mubr.msk.f32.mxu0 %vm9450_vm0, %v9451_v8  ;;  %8911 = vmatprep.mubr.msk.f32.mxu1 %vm9450_vm0, %v9451_v8 }
 0x93f   :  { %9290 = vmatpush3.bf16.msra.mxu0 %v9289_v27  ;;  %9308 = vmatpush3.bf16.msra.mxu1 %v9283_v9 }
 0x940   :  { %9297 = vmatprep.subr.bf16.mxu0 %v9449_v3  ;;  %8925 = vmatprep.subr.mxu1 %v9451_v8 }
 0x942   :  { %8879 = vmatmul.mubr.msk.f32.vlgmr.msra.gmra.mrb[72].mxu0 %vm3671_vm3, %v10051_v30  ;;  %8912 = vmatmul.mubr.msk.f32.vlgmr.msra.gmra.mrb[68].mxu1 %vm3671_vm3, %v10075_v38 }
 0x943   :  { %9299 = vmatpush3.bf16.msra.mxu0 %v9274_v13  ;;  %8900 = vmatprep.mubr.msk.f32.mxu0 %vm9450_vm0, %v9451_v8 }
 0x944   :  { %9300 = vmatprep.subr.bf16.mxu0 %v9449_v3  ;;  %8927 = vmatprep.mubr.msk.f32.mxu1 %vm9450_vm0, %v9451_v8 }
 0x947   :  { %9302 = vmatpush3.bf16.msra.mxu0 %v9277_v18 }
 0x948   :  { %9309 = vmatprep.subr.bf16.mxu0 %v9449_v3 }
 0x94a   :  { %8901 = vmatmul.mubr.msk.f32.vlgmr.msra.gmra.mrb[74].mxu0 %vm3671_vm3, %v10075_v38 }
 0x94b   :  { %9311 = vmatpush3.bf16.msra.mxu0 %v9286_v23  ;;  %8922 = vmatprep.mubr.msk.f32.mxu0 %vm9450_vm0, %v9451_v8 }
 0x94c   :  { %9312 = vmatprep.subr.bf16.mxu0 %v9449_v3 }
 0x94f   :  { %9314 = vmatpush3.bf16.msra.mxu0 %v9289_v27 }
 0x950   :  { %8935 = vmatprep.subr.mxu0 %v9451_v8 }
 0x952   :  { %8923 = vmatmul.mubr.msk.f32.vlgmr.msra.gmra.mrb[76].mxu0 %vm3671_vm3, %v10075_v38 }
 0x953   :  { %8937 = vmatprep.mubr.msk.f32.mxu0 %vm9450_vm0, %v9451_v8 }
 0x9c5   :  { %v4053_v28 = vpop.f32.mrb[52].mxu0  ;;  %v4193_v29 = vpop.f32.mrb[48].mxu1 }
 0x9c6   :  { %v8671_v31 = vpop.f32.mrb[53].mxu0  ;;  %v8693_v32 = vpop.f32.mrb[49].mxu1 }
 0x9cd   :  { %v4123_v33 = vpop.f32.mrb[54].mxu0  ;;  %v4336_v34 = vpop.f32.mrb[50].mxu1 }
 0x9ce   :  { %v8682_v35 = vpop.f32.mrb[55].mxu0  ;;  %v8715_v36 = vpop.f32.mrb[51].mxu1 }
 0x9d5   :  { %v4263_v37 = vpop.f32.mrb[56].mxu0  ;;  %v4476_v39 = vpop.f32.mrb[52].mxu1 }
 0x9d6   :  { %v8704_v3 = vpop.f32.mrb[57].mxu0  ;;  %v8737_v40 = vpop.f32.mrb[53].mxu1 }
 0x9dd   :  { %v4406_v41 = vpop.f32.mrb[58].mxu0  ;;  %v4632_v42 = vpop.f32.mrb[54].mxu1 }
 0x9de   :  { %v8726_v43 = vpop.f32.mrb[59].mxu0  ;;  %v8759_v44 = vpop.f32.mrb[55].mxu1  ;;  %8926 = vmatpush3.xpose.msk.msra.mxu1 %vm1794_vm2, %v4632_v42 }
 0x9df   :  { %8930 = vmatprep.subr.mxu1 %v9451_v8 }
 0x9e1   :  { %8928 = vmatmul.mubr.msk.f32.vlgmr.msra.gmra.mrb[70].mxu1 %vm1794_vm2, %v4053_v28 }
 0x9e2   :  { %8932 = vmatprep.mubr.msk.f32.mxu1 %vm9450_vm0, %v9451_v8 }
 0x9e5   :  { %v4546_v45 = vpop.f32.mrb[60].mxu0  ;;  %v4772_v46 = vpop.f32.mrb[56].mxu1 }
 0x9e6   :  { %v8748_v47 = vpop.f32.mrb[61].mxu0  ;;  %v8781_v48 = vpop.f32.mrb[57].mxu1  ;;  %8936 = vmatpush3.xpose.msk.msra.mxu0 %vm1794_vm2, %v4772_v46 }
 0x9e7   :  { %8945 = vmatprep.subr.mxu0 %v9451_v8 }
 0x9e9   :  { %8938 = vmatmul.mubr.msk.f32.vlgmr.msra.gmra.mrb[78].mxu0 %vm1794_vm2, %v4193_v29 }
 0x9ea   :  { %8947 = vmatprep.mubr.msk.f32.mxu0 %vm9450_vm0, %v9451_v8 }
 0x9ed   :  { %v4702_v49 = vpop.f32.mrb[62].mxu0  ;;  %v4912_v50 = vpop.f32.mrb[58].mxu1 }
 0x9ee   :  { %v8770_v51 = vpop.f32.mrb[63].mxu0  ;;  %v8803_v52 = vpop.f32.mrb[59].mxu1  ;;  %8931 = vmatpush3.xpose.msk.msra.mxu1 %vm1794_vm2, %v4702_v49  ;;  %8946 = vmatpush3.xpose.msk.msra.mxu0 %vm1794_vm2, %v4912_v50 }
 0x9ef   :  { %8940 = vmatprep.subr.mxu1 %v9451_v8  ;;  %8955 = vmatprep.subr.mxu0 %v9451_v8 }
 0x9f1   :  { %8933 = vmatmul.mubr.msk.f32.vlgmr.msra.gmra.mrb[72].mxu1 %vm1794_vm2, %v4123_v33  ;;  %8948 = vmatmul.mubr.msk.f32.vlgmr.msra.gmra.mrb[80].mxu0 %vm1794_vm2, %v4336_v34 }
 0x9f2   :  { %8942 = vmatprep.mubr.msk.f32.mxu1 %vm9450_vm0, %v9451_v8  ;;  %8957 = vmatprep.mubr.msk.f32.mxu0 %vm9450_vm0, %v9451_v8 }
 0x9f5   :  { %v4842_v53 = vpop.f32.mrb[64].mxu0  ;;  %v5052_v54 = vpop.f32.mrb[60].mxu1 }
 0x9f6   :  { %v8792_v55 = vpop.f32.mrb[65].mxu0  ;;  %v8825_v56 = vpop.f32.mrb[61].mxu1  ;;  %8941 = vmatpush3.xpose.msk.msra.mxu1 %vm1794_vm2, %v4842_v53  ;;  %8956 = vmatpush3.xpose.msk.msra.mxu0 %vm1794_vm2, %v5052_v54 }
 0x9f7   :  { %8950 = vmatprep.subr.mxu1 %v9451_v8  ;;  %8965 = vmatprep.subr.mxu0 %v9451_v8 }
 0x9f9   :  { %8943 = vmatmul.mubr.msk.f32.vlgmr.msra.gmra.mrb[74].mxu1 %vm1794_vm2, %v4263_v37  ;;  %8958 = vmatmul.mubr.msk.f32.vlgmr.msra.gmra.mrb[82].mxu0 %vm1794_vm2, %v4476_v39 }
 0x9fa   :  { %8952 = vmatprep.mubr.msk.f32.mxu1 %vm9450_vm0, %v9451_v8  ;;  %8967 = vmatprep.mubr.msk.f32.mxu0 %vm9450_vm0, %v9451_v8 }
 0x9fd   :  { %v4982_v57 = vpop.f32.mrb[66].mxu0  ;;  %v5208_v58 = vpop.f32.mrb[62].mxu1 }
 0x9fe   :  { %v8814_v20 = vpop.f32.mrb[67].mxu0  ;;  %v8847_v59 = vpop.f32.mrb[63].mxu1  ;;  %8951 = vmatpush3.xpose.msk.msra.mxu1 %vm1794_vm2, %v4982_v57  ;;  %8966 = vmatpush3.msra.mxu0 %v5208_v58 }
 0x9ff   :  { %8960 = vmatprep.subr.mxu1 %v9451_v8  ;;  %8975 = vmatprep.subr.mxu0 %v9451_v8 }
 0xa01   :  { %8953 = vmatmul.mubr.msk.f32.vlgmr.msra.gmra.mrb[76].mxu1 %vm1794_vm2, %v4406_v41 }
 0xa02   :  { %8962 = vmatprep.mubr.msk.f32.mxu1 %vm9450_vm0, %v9451_v8 }
 0xa05   :  { %v5122_v12 = vpop.f32.mrb[68].mxu0  ;;  %v10345_v22 = vpop.f32.mrb[64].mxu1 }
 0xa06   :  { %v8836_v60 = vpop.f32.mrb[69].mxu0  ;;  %v8869_v61 = vpop.f32.mrb[65].mxu1  ;;  %8961 = vmatpush3.xpose.msk.msra.mxu1 %vm1794_vm2, %v5122_v12 }
 0xa07   :  { %8970 = vmatprep.subr.mxu1 %v9451_v8 }
 0xa09   :  { %8963 = vmatmul.mubr.msk.f32.vlgmr.msra.gmra.mrb[78].mxu1 %vm1794_vm2, %v4546_v45 }
 0xa0a   :  { %8972 = vmatprep.mubr.msk.f32.mxu1 %vm9450_vm0, %v9451_v8 }
 0xa0d   :  { %v5278_v14 = vpop.f32.mrb[70].mxu0  ;;  %v10352_v24 = vpop.f32.mrb[66].mxu1 }
 0xa0e   :  { %v8858_v16 = vpop.f32.mrb[71].mxu0  ;;  %v8891_v62 = vpop.f32.mrb[67].mxu1  ;;  %8971 = vmatpush3.msra.mxu1 %v5278_v14 }
 0xa0f   :  { %8980 = vmatprep.subr.mxu1 %v9451_v8 }
 0xa15   :  { %v10355_v63 = vpop.f32.mrb[72].mxu0  ;;  %v10357_v0 = vpop.f32.mrb[68].mxu1 }
 0xa16   :  { %v8880_v1 = vpop.f32.mrb[73].mxu0  ;;  %v8913_v2 = vpop.f32.mrb[69].mxu1 }
 0xa1d   :  { %v10359_v4 = vpop.f32.mrb[74].mxu0 }
 0xa1e   :  { %v8902_v5 = vpop.f32.mrb[75].mxu0 }
 0xa25   :  { %v10361_v6 = vpop.f32.mrb[76].mxu0 }
 0xa26   :  { %v8924_v7 = vpop.f32.mrb[77].mxu0 }
 0xab4   :  { %v5774_v9 = vpop.f32.mrb[70].mxu1 }
 0xab5   :  { %v6310_v10 = vmul.f32 0.35355338, %v5774_v9  ;;  %v8929_v11 = vpop.f32.mrb[71].mxu1 }
 0xab7   :  { %v6318_v13 = vsel %vm1794_vm2, %v6310_v10, -inf }
 0xab8   :  { %6319 = vmax.xlane.f32.xlu0 %v6318_v13 }
 0xabc   :  { %v5926_v15 = vpop.f32.mrb[78].mxu0 }
 0xabd   :  { %v6312_v17 = vmul.f32 0.35355338, %v5926_v15  ;;  %v8939_v18 = vpop.f32.mrb[79].mxu0 }
 0xabf   :  { %v6324_v19 = vsel %vm1794_vm2, %v6312_v17, -inf }
 0xac0   :  { %6325 = vmax.xlane.f32.xlu0 %v6324_v19 }
 0xac4   :  { %v5850_v21 = vpop.f32.mrb[72].mxu1  ;;  %v6078_v23 = vpop.f32.mrb[80].mxu0 }
 0xac5   :  { %v6311_v25 = vmul.f32 0.35355338, %v5850_v21  ;;  %v6314_v26 = vmul.f32 0.35355338, %v6078_v23  ;;  %v8934_v27 = vpop.f32.mrb[73].mxu1  ;;  %v8949_v28 = vpop.f32.mrb[81].mxu0 }
 0xac7   :  { %v6321_v29 = vsel %vm1794_vm2, %v6311_v25, -inf  ;;  %v6330_v31 = vsel %vm1794_vm2, %v6314_v26, -inf }
 0xac8   :  { %6322 = vmax.xlane.f32.xlu1 %v6321_v29  ;;  %6331 = vmax.xlane.f32.xlu0 %v6330_v31 }
 0xacc   :  { %v6002_v32 = vpop.f32.mrb[74].mxu1  ;;  %v6230_v33 = vpop.f32.mrb[82].mxu0 }
 0xacd   :  { %v6313_v34 = vmul.f32 0.35355338, %v6002_v32  ;;  %v6316_v35 = vmul.f32 0.35355338, %v6230_v33  ;;  %v8944_v36 = vpop.f32.mrb[75].mxu1  ;;  %v8959_v37 = vpop.f32.mrb[83].mxu0 }
 0xacf   :  { %v6327_v39 = vsel %vm1794_vm2, %v6313_v34, -inf  ;;  %v6336_v3 = vsel %vm1794_vm2, %v6316_v35, -inf }
 0xad0   :  { %6328 = vmax.xlane.f32.xlu1 %v6327_v39  ;;  %6337 = vmax.xlane.f32.xlu0 %v6336_v3 }
 0xad4   :  { %v6154_v40 = vpop.f32.mrb[76].mxu1 }
 0xad5   :  { %v6315_v41 = vmul.f32 0.35355338, %v6154_v40  ;;  %v8954_v42 = vpop.f32.mrb[77].mxu1 }
 0xad7   :  { %v6333_v43 = vsel %vm1794_vm2, %v6315_v41, -inf }
 0xad8   :  { %6334 = vmax.xlane.f32.xlu1 %v6333_v43 }
 0xadc   :  { %v6306_v44 = vpop.f32.mrb[78].mxu1 }
 0xadd   :  { %v6317_v45 = vmul.f32 0.35355338, %v6306_v44  ;;  %v8964_v46 = vpop.f32.mrb[79].mxu1 }
 0xadf   :  { %v6339_v47 = vsel %vm1794_vm2, %v6317_v45, -inf }
 0xae0   :  { %6340 = vmax.xlane.f32.xlu1 %v6339_v47 }
 0xb45   :  { %v6320_v48 = vpop.xlane.xlu0 %6319 }
 0xb46   :  { %v6342_v49 = vsub.f32 %v6310_v10, %v6320_v48 }
 0xb48   :  { %v6350_v50 = vmul.f32 1.442695, %v6342_v49 }
 0xb4a   :  { %9385 = vpow2.f32 %v6350_v50 }
 0xb4d   :  { %v6326_v51 = vpop.xlane.xlu0 %6325 }
 0xb4e   :  { %v6344_v52 = vsub.f32 %v6312_v17, %v6326_v51 }
 0xb50   :  { %v6354_v53 = vmul.f32 1.442695, %v6344_v52  ;;  %v6990_v52 = vld [vmem:[%s10559_s16] sm:$0xff] }
 0xb52   :  { %9387 = vpow2.f32 %v6354_v53  ;;  %v6992_v53 = vld [vmem:[%s10559_s16 + $0x10] sm:$0xff] }
 0xb54   :  { %v9386_v54 = vpop.eup %9385 }
 0xb55   :  { %v6323_v55 = vpop.xlane.xlu1 %6322  ;;  %v6332_v56 = vpop.xlane.xlu0 %6331  ;;  %v6366_v57 = vsel %vm1794_vm2, %v9386_v54, 0.0 }
 0xb56   :  { %v6343_v58 = vsub.f32 %v6311_v25, %v6323_v55  ;;  %v6346_v20 = vsub.f32 %v6314_v26, %v6332_v56  ;;  %6367 = vadd.xlane.f32.xlu0 %v6366_v57 }
 0xb58   :  { %v6352_v59 = vmul.f32 1.442695, %v6343_v58  ;;  %v6358_v12 = vmul.f32 1.442695, %v6346_v20  ;;  %v6993_v58 = vld [vmem:[%s10559_s16 + $0x18] sm:$0xff] }
 0xb5a   :  { %9389 = vpow2.f32 %v6352_v59 }
 0xb5b   :  { %9391 = vpow2.f32 %v6358_v12 }
 0xb5c   :  { %v9388_v60 = vpop.eup %9387 }
 0xb5d   :  { %v6329_v61 = vpop.xlane.xlu1 %6328  ;;  %v6338_v14 = vpop.xlane.xlu0 %6337  ;;  %v6372_v16 = vsel %vm1794_vm2, %v9388_v60, 0.0 }
 0xb5e   :  { %v6345_v62 = vsub.f32 %v6313_v34, %v6329_v61  ;;  %v6348_v1 = vsub.f32 %v6316_v35, %v6338_v14  ;;  %6373 = vadd.xlane.f32.xlu0 %v6372_v16 }
 0xb60   :  { %v6356_v2 = vmul.f32 1.442695, %v6345_v62  ;;  %v6362_v5 = vmul.f32 1.442695, %v6348_v1 }
 0xb62   :  { %9393 = vpow2.f32 %v6356_v2 }
 0xb63   :  { %9395 = vpow2.f32 %v6362_v5 }
 0xb64   :  { %v9390_v7 = vpop.eup %9389 }
 0xb65   :  { %v9392_v9 = vpop.eup %9391  ;;  %v6335_v10 = vpop.xlane.xlu1 %6334  ;;  %v6369_v11 = vsel %vm1794_vm2, %v9390_v7, 0.0 }
 0xb66   :  { %v6347_v13 = vsub.f32 %v6315_v41, %v6335_v10  ;;  %6370 = vadd.xlane.f32.xlu1 %v6369_v11  ;;  %v6378_v15 = vsel %vm1794_vm2, %v9392_v9, 0.0 }
 0xb67   :  { %6379 = vadd.xlane.f32.xlu0 %v6378_v15 }
 0xb68   :  { %v6360_v17 = vmul.f32 1.442695, %v6347_v13 }
 0xb6a   :  { %9397 = vpow2.f32 %v6360_v17 }
 0xb6c   :  { %v9394_v18 = vpop.eup %9393 }
 0xb6d   :  { %v9396_v19 = vpop.eup %9395  ;;  %v6341_v21 = vpop.xlane.xlu1 %6340  ;;  %v6375_v23 = vsel %vm1794_vm2, %v9394_v18, 0.0 }
 0xb6e   :  { %v6349_v25 = vsub.f32 %v6317_v45, %v6341_v21  ;;  %6376 = vadd.xlane.f32.xlu1 %v6375_v23  ;;  %v6384_v26 = vsel %vm1794_vm2, %v9396_v19, 0.0 }
 0xb6f   :  { %6385 = vadd.xlane.f32.xlu0 %v6384_v26 }
 0xb70   :  { %v6364_v27 = vmul.f32 1.442695, %v6349_v25 }
 0xb72   :  { %9399 = vpow2.f32 %v6364_v27 }
 0xb74   :  { %v9398_v28 = vpop.eup %9397 }
 0xb75   :  { %v6381_v29 = vsel %vm1794_vm2, %v9398_v28, 0.0 }
 0xb76   :  { %6382 = vadd.xlane.f32.xlu1 %v6381_v29 }
 0xb7c   :  { %v9400_v31 = vpop.eup %9399 }
 0xb7d   :  { %v6387_v32 = vsel %vm1794_vm2, %v9400_v31, 0.0 }
 0xb7e   :  { %6388 = vadd.xlane.f32.xlu1 %v6387_v32 }
 0xbe3   :  { %v6368_v33 = vpop.xlane.xlu0 %6367 }
 0xbe4   :  { %9401 = vrcp.f32 %v6368_v33 }
 0xbeb   :  { %v6374_v34 = vpop.xlane.xlu0 %6373 }
 0xbec   :  { %9403 = vrcp.f32 %v6374_v34 }
 0xbee   :  { %v9402_v35 = vpop.eup %9401 }
 0xbef   :  { %v6398_v36 = vmul.f32 %v9402_v35, %v9386_v54 }
 0xbf1   :  { %8968 = vmatmul.mubr.msk.f32.vlgmr.msra.gmra.mrb[84].mxu0 %vm1794_vm2, %v6398_v36 }
 0xbf2   :  { %8976 = vmatpush3.msra.mxu0 %v10345_v22  ;;  %8977 = vmatprep.mubr.msk.f32.mxu0 %vm9450_vm0, %v9451_v8 }
 0xbf3   :  { %v6371_v37 = vpop.xlane.xlu1 %6370  ;;  %8985 = vmatprep.subr.mxu0 %v9451_v8 }
 0xbf4   :  { %9405 = vrcp.f32 %v6371_v37  ;;  %v6380_v39 = vpop.xlane.xlu0 %6379 }
 0xbf5   :  { %9407 = vrcp.f32 %v6380_v39 }
 0xbf6   :  { %v9404_v3 = vpop.eup %9403 }
 0xbf7   :  { %v6400_v40 = vmul.f32 %v9404_v3, %v9388_v60 }
 0xbf9   :  { %8978 = vmatmul.mubr.msk.f32.vlgmr.msra.gmra.mrb[86].mxu0 %vm1794_vm2, %v6400_v40 }
 0xbfa   :  { %8986 = vmatpush3.msra.mxu0 %v10352_v24  ;;  %8987 = vmatprep.mubr.msk.f32.mxu0 %vm9450_vm0, %v9451_v8 }
 0xbfb   :  { %v6377_v41 = vpop.xlane.xlu1 %6376  ;;  %8995 = vmatprep.subr.mxu0 %v9451_v8 }
 0xbfc   :  { %9409 = vrcp.f32 %v6377_v41  ;;  %v6386_v22 = vpop.xlane.xlu0 %6385 }
 0xbfd   :  { %9411 = vrcp.f32 %v6386_v22 }
 0xbfe   :  { %v9406_v42 = vpop.eup %9405 }
 0xbff   :  { %v9408_v43 = vpop.eup %9407  ;;  %v6399_v44 = vmul.f32 %v9406_v42, %v9390_v7 }
 0xc00   :  { %v6402_v45 = vmul.f32 %v9408_v43, %v9392_v9 }
 0xc01   :  { %8973 = vmatmul.mubr.msk.f32.vlgmr.msra.gmra.mrb[80].mxu1 %vm1794_vm2, %v6399_v44 }
 0xc02   :  { %8981 = vmatpush3.msra.mxu1 %v10355_v63  ;;  %8988 = vmatmul.mubr.msk.f32.vlgmr.msra.gmra.mrb[88].mxu0 %vm1794_vm2, %v6402_v45 }
 0xc03   :  { %8996 = vmatpush3.msra.mxu0 %v10357_v0  ;;  %v6383_v24 = vpop.xlane.xlu1 %6382  ;;  %8982 = vmatprep.mubr.msk.f32.mxu1 %vm9450_vm0, %v9451_v8 }
 0xc04   :  { %9413 = vrcp.f32 %v6383_v24  ;;  %8990 = vmatprep.subr.mxu1 %v9451_v8  ;;  %8997 = vmatprep.mubr.msk.f32.mxu0 %vm9450_vm0, %v9451_v8 }
 0xc05   :  { %9005 = vmatprep.subr.mxu0 %v9451_v8 }
 0xc06   :  { %v9410_v46 = vpop.eup %9409 }
 0xc07   :  { %v9412_v47 = vpop.eup %9411  ;;  %v6401_v48 = vmul.f32 %v9410_v46, %v9394_v18 }
 0xc08   :  { %v6404_v63 = vmul.f32 %v9412_v47, %v9396_v19 }
 0xc09   :  { %8983 = vmatmul.mubr.msk.f32.vlgmr.msra.gmra.mrb[82].mxu1 %vm1794_vm2, %v6401_v48 }
 0xc0a   :  { %8991 = vmatpush3.msra.mxu1 %v10359_v4  ;;  %8998 = vmatmul.mubr.msk.f32.vlgmr.msra.gmra.mrb[90].mxu0 %vm1794_vm2, %v6404_v63 }
 0xc0b   :  { %v6389_v0 = vpop.xlane.xlu1 %6388  ;;  %8992 = vmatprep.mubr.msk.f32.mxu1 %vm9450_vm0, %v9451_v8  ;;  %9000 = vmatprep.subr.mxu1 %v9451_v8 }
 0xc0c   :  { %9415 = vrcp.f32 %v6389_v0  ;;  %9007 = vmatprep.mubr.msk.f32.mxu0 %vm9450_vm0, %v9451_v8  ;;  %9006 = vmatpush3.msra.mxu0 %v6990_v52 }
 0xc0d   :  { %9015 = vmatprep.subr.mxu0 %v9451_v8 }
 0xc0e   :  { %v9414_v49 = vpop.eup %9413 }
 0xc0f   :  { %v6403_v50 = vmul.f32 %v9414_v49, %v9398_v28 }
 0xc11   :  { %8993 = vmatmul.mubr.msk.f32.vlgmr.msra.gmra.mrb[84].mxu1 %vm1794_vm2, %v6403_v50 }
 0xc12   :  { %9001 = vmatpush3.msra.mxu1 %v10361_v6  ;;  %9002 = vmatprep.mubr.msk.f32.mxu1 %vm9450_vm0, %v9451_v8  ;;  %v6991_v6 = vld [vmem:[%s10559_s16 + $0x8] sm:$0xff] }
 0xc13   :  { %9010 = vmatprep.subr.mxu1 %v9451_v8 }
 0xc16   :  { %v9416_v4 = vpop.eup %9415 }
 0xc17   :  { %v6405_v51 = vmul.f32 %v9416_v4, %v9400_v31 }
 0xc19   :  { %9003 = vmatmul.mubr.msk.f32.vlgmr.msra.gmra.mrb[86].mxu1 %vm1794_vm2, %v6405_v51 }
 0xc1a   :  { %9012 = vmatprep.mubr.msk.f32.mxu1 %vm9450_vm0, %v9451_v8  ;;  %9011 = vmatpush3.msra.mxu1 %v6991_v6 }
 0xc1b   :  { %9020 = vmatprep.subr.mxu1 %v9451_v8 }
 0xcc4   :  { %v6475_v54 = vpop.f32.mrb[84].mxu0 }
 0xcc5   :  { %v8969_v55 = vpop.f32.mrb[85].mxu0  ;;  %9008 = vmatmul.mubr.msk.f32.vlgmr.msra.gmra.mrb[92].mxu0 %vm1794_vm2, %v6475_v54  ;;  %v7640_v54 = vld [vmem:[%s10562_s19 + $0x10] sm:$0xff] }
 0xcc6   :  { %9016 = vmatpush3.msra.mxu0 %v6992_v53  ;;  %9017 = vmatprep.mubr.msk.f32.mxu0 %vm9450_vm0, %v9451_v8  ;;  %v7641_v55 = vld [vmem:[%s10562_s19 + $0x18] sm:$0xff] }
 0xcc7   :  { %9025 = vmatprep.subr.mxu0 %v9451_v8 }
 0xccc   :  { %v6621_v56 = vpop.f32.mrb[86].mxu0 }
 0xccd   :  { %v8979_v57 = vpop.f32.mrb[87].mxu0  ;;  %9018 = vmatmul.mubr.msk.f32.vlgmr.msra.gmra.mrb[94].mxu0 %vm1794_vm2, %v6621_v56  ;;  %v9319_v56 = vpack.c.bf16 %v7641_v55, %v7640_v54 }
 0xcce   :  { %9026 = vmatpush3.msra.mxu0 %v6990_v52  ;;  %9027 = vmatprep.mubr.msk.f32.mxu0 %vm9450_vm0, %v9451_v8  ;;  %v7732_v57 = vld [vmem:[%s10564_s21] sm:$0xff] }
 0xccf   :  { %9035 = vmatprep.subr.mxu0 %v9451_v8 }
 0xcd4   :  { %v6548_v20 = vpop.f32.mrb[80].mxu1 }
 0xcd5   :  { %v6767_v59 = vpop.f32.mrb[88].mxu0  ;;  %v8974_v12 = vpop.f32.mrb[81].mxu1  ;;  %9013 = vmatmul.mubr.msk.f32.vlgmr.msra.gmra.mrb[88].mxu1 %vm1794_vm2, %v6548_v20  ;;  %v7734_v20 = vld [vmem:[%s10564_s21 + $0x10] sm:$0xff] }
 0xcd6   :  { %v8989_v60 = vpop.f32.mrb[89].mxu0  ;;  %9028 = vmatmul.mubr.msk.f32.vlgmr.msra.gmra.mrb[96].mxu0 %vm1794_vm2, %v6767_v59  ;;  %9021 = vmatpush3.msra.mxu1 %v6993_v58  ;;  %v7735_v12 = vld [vmem:[%s10564_s21 + $0x18] sm:$0xff] }
 0xcd7   :  { %9022 = vmatprep.mubr.msk.f32.mxu1 %vm9450_vm0, %v9451_v8  ;;  %9036 = vmatpush3.msra.mxu0 %v6992_v53  ;;  %v9327_v60 = vpack.c.bf16 %v7735_v12, %v7734_v20 }
 0xcd8   :  { %9037 = vmatprep.mubr.msk.f32.mxu0 %vm9450_vm0, %v9451_v8  ;;  %9030 = vmatprep.subr.mxu1 %v9451_v8 }
 0xcdc   :  { %v6694_v61 = vpop.f32.mrb[82].mxu1 }
 0xcdd   :  { %v6913_v14 = vpop.f32.mrb[90].mxu0  ;;  %v8984_v16 = vpop.f32.mrb[83].mxu1  ;;  %9023 = vmatmul.mubr.msk.f32.vlgmr.msra.gmra.mrb[90].mxu1 %vm1794_vm2, %v6694_v61  ;;  %v7736_v61 = vld [vmem:[%s10564_s21 + $0x20] sm:$0xff] }
 0xcde   :  { %v8999_v62 = vpop.f32.mrb[91].mxu0  ;;  %9038 = vmatmul.mubr.msk.f32.vlgmr.msra.gmra.mrb[98].mxu0 %vm1794_vm2, %v6913_v14  ;;  %9031 = vmatpush3.msra.mxu1 %v6991_v6  ;;  %v7639_v6 = vld [vmem:[%s10562_s19 + $0x8] sm:$0xff] }
 0xcdf   :  { %9032 = vmatprep.mubr.msk.f32.mxu1 %vm9450_vm0, %v9451_v8  ;;  %9040 = vmatprep.subr.mxu1 %v9451_v8  ;;  %v7737_v14 = vld [vmem:[%s10564_s21 + $0x28] sm:$0xff] }
 0xce0   :  { %v9331_v16 = vpack.c.bf16 %v7737_v14, %v7736_v61 }
 0xce4   :  { %v6840_v1 = vpop.f32.mrb[84].mxu1 }
 0xce5   :  { %v8994_v2 = vpop.f32.mrb[85].mxu1  ;;  %9033 = vmatmul.mubr.msk.f32.vlgmr.msra.gmra.mrb[92].mxu1 %vm1794_vm2, %v6840_v1 }
 0xce6   :  { %9041 = vmatpush3.msra.mxu1 %v6993_v58  ;;  %9042 = vmatprep.mubr.msk.f32.mxu1 %vm9450_vm0, %v9451_v8  ;;  %v7733_v58 = vld [vmem:[%s10564_s21 + $0x8] sm:$0xff] }
 0xce7   :  { %v9323_v59 = vpack.c.bf16 %v7733_v58, %v7732_v57 }
 0xce9   :  { %9324 = vmatprep.subr.bf16.mxu1 %v9323_v59 }
 0xcec   :  { %v6986_v5 = vpop.f32.mrb[86].mxu1 }
 0xced   :  { %v9004_v7 = vpop.f32.mrb[87].mxu1  ;;  %9043 = vmatmul.mubr.msk.f32.vlgmr.msra.gmra.mrb[94].mxu1 %vm1794_vm2, %v6986_v5 }
 0xcee   :  { %9326 = vmatpush3.bf16.msra.mxu1 %v9323_v59  ;;  %v8013_v7 = vld [vmem:[%s10560_s17] ss:$0 sm:$0xff] }
 0xcef   :  { %9328 = vmatprep.subr.bf16.mxu1 %v9327_v60 }
 0xcf2   :  { %9330 = vmatpush3.bf16.msra.mxu1 %v9327_v60 }
 0xcf3   :  { %9332 = vmatprep.subr.bf16.mxu1 %v9331_v16 }
 0xcf6   :  { %9334 = vmatpush3.bf16.msra.mxu1 %v9331_v16 }
 0xd98   :  { %v7063_v9 = vpop.f32.mrb[92].mxu0 }
 0xd99   :  { %v9009_v10 = vpop.f32.mrb[93].mxu0  ;;  %v7578_v17 = vsel %vm3671_vm3, %v7063_v9, 0.0 }
 0xda0   :  { %v7209_v11 = vpop.f32.mrb[94].mxu0 }
 0xda1   :  { %v9019_v13 = vpop.f32.mrb[95].mxu0  ;;  %v7581_v26 = vsel %vm3671_vm3, %v7209_v11, 0.0 }
 0xda2   :  { %v8014_v13 = vld [vmem:[%s10561_s18] ss:$0 sm:$0xff] }
 0xda8   :  { %v7136_v15 = vpop.f32.mrb[88].mxu1 }
 0xda9   :  { %v7579_v18 = vsel %vm3671_vm3, %v7136_v15, 0.0  ;;  %v7355_v19 = vpop.f32.mrb[96].mxu0  ;;  %v9014_v21 = vpop.f32.mrb[89].mxu1 }
 0xdaa   :  { %v7580_v23 = vadd.f32 %v7579_v18, %v7578_v17  ;;  %v9029_v25 = vpop.f32.mrb[97].mxu0  ;;  %v7585_v37 = vsel %vm3671_vm3, %v7355_v19, 0.0 }
 0xdac   :  { %v7582_v8 = vadd.f32 %v7581_v26, %v7580_v23  ;;  %v7738_v26 = vld [vmem:[%s10564_s21 + $0x30] sm:$0xff] }
 0xdb0   :  { %v7282_v27 = vpop.f32.mrb[90].mxu1 }
 0xdb1   :  { %v7583_v28 = vsel %vm3671_vm3, %v7282_v27, 0.0  ;;  %v7501_v29 = vpop.f32.mrb[98].mxu0  ;;  %v9024_v31 = vpop.f32.mrb[91].mxu1 }
 0xdb2   :  { %v7584_v32 = vadd.f32 %v7583_v28, %v7582_v8  ;;  %v9039_v33 = vpop.f32.mrb[99].mxu0  ;;  %v7588_v41 = vsel %vm3671_vm3, %v7501_v29, 0.0  ;;  %v7739_v8 = vld [vmem:[%s10564_s21 + $0x38] sm:$0xff]  ;;  %v8015_v28 = vld [vmem:[%s10563_s20] ss:$0 sm:$0xff] }
 0xdb3   :  { %v9335_v27 = vpack.c.bf16 %v7739_v8, %v7738_v26 }
 0xdb4   :  { %v7592_v34 = vadd.f32 %v7584_v32, %v10051_v30 }
 0xdb5   :  { %9336 = vmatprep.subr.bf16.mxu1 %v9335_v27 }
 0xdb6   :  { %v7596_v35 = vsel %vm3671_vm3, %v7592_v34, 0.0  ;;  %9338 = vmatpush3.bf16.msra.mxu1 %v9335_v27 }
 0xdb7   :  { %7597 = vadd.xlane.f32.xlu0 %v7596_v35 }
 0xdb8   :  { %v7428_v36 = vpop.f32.mrb[92].mxu1 }
 0xdb9   :  { %v7586_v39 = vsel %vm3671_vm3, %v7428_v36, 0.0  ;;  %v9034_v3 = vpop.f32.mrb[93].mxu1  ;;  %v8018_v36 = vld [vmem:[%s10565_s22] ss:$0 sm:$0xff] }
 0xdba   :  { %v7587_v40 = vadd.f32 %v7586_v39, %v7585_v37 }
 0xdbc   :  { %v7589_v22 = vadd.f32 %v7588_v41, %v7587_v40 }
 0xdc0   :  { %v7574_v42 = vpop.f32.mrb[94].mxu1 }
 0xdc1   :  { %v7590_v43 = vsel %vm3671_vm3, %v7574_v42, 0.0  ;;  %v9044_v44 = vpop.f32.mrb[95].mxu1 }
 0xdc2   :  { %v7591_v45 = vadd.f32 %v7590_v43, %v7589_v22 }
 0xdc4   :  { %v7593_v30 = vadd.f32 %v7591_v45, %v10075_v38  ;;  %v7638_v38 = vld [vmem:[%s10562_s19] sm:$0xff] }
 0xdc5   :  { %v9315_v53 = vpack.c.bf16 %v7639_v6, %v7638_v38  ;;  %v8021_v6 = vld [vmem:[%s10566_s23] ss:$0 sm:$0xff] }
 0xdc6   :  { %v7599_v24 = vsel %vm3671_vm3, %v7593_v30, 0.0 }
 0xdc7   :  { %7600 = vadd.xlane.f32.xlu1 %v7599_v24  ;;  %9316 = vmatprep.subr.bf16.mxu0 %v9315_v53 }
 0xdc8   :  { %9318 = vmatpush3.bf16.msra.mxu0 %v9315_v53 }
 0xdc9   :  { %9320 = vmatprep.subr.bf16.mxu0 %v9319_v56 }
 0xdcc   :  { %9322 = vmatpush3.bf16.msra.mxu0 %v9319_v56  ;;  %v8022_v56 = vld [vmem:[%s10567_s24] ss:$0 sm:$0xff] }
 0xe44   :  { %v7598_v46 = vpop.xlane.xlu0 %7597 }
 0xe45   :  { %v7602_v47 = vmul.f32 0.03125, %v7598_v46 }
 0xe47   :  { %v7604_v48 = vsub.f32 %v7592_v34, %v7602_v47 }
 0xe49   :  { %v7606_v63 = vmul.f32 %v7604_v48, %v7604_v48 }
 0xe4b   :  { %v7608_v0 = vsel %vm3671_vm3, %v7606_v63, 0.0 }
 0xe4c   :  { %7609 = vadd.xlane.f32.xlu0 %v7608_v0 }
 0xe54   :  { %v7601_v49 = vpop.xlane.xlu1 %7600 }
 0xe55   :  { %v7603_v50 = vmul.f32 0.03125, %v7601_v49 }
 0xe57   :  { %v7605_v4 = vsub.f32 %v7593_v30, %v7603_v50 }
 0xe59   :  { %v7607_v51 = vmul.f32 %v7605_v4, %v7605_v4 }
 0xe5b   :  { %v7611_v52 = vsel %vm3671_vm3, %v7607_v51, 0.0 }
 0xe5c   :  { %7612 = vadd.xlane.f32.xlu1 %v7611_v52 }
 0xed9   :  { %v7610_v62 = vpop.xlane.xlu0 %7609 }
 0xeda   :  { %v7614_v1 = vmul.f32 0.03125, %v7610_v62 }
 0xedc   :  { %v7616_v2 = vadd.f32 1e-06, %v7614_v1 }
 0xede   :  { %9417 = vrsqrt.f32 %v7616_v2 }
 0xee8   :  { %v9418_v5 = vpop.eup %9417 }
 0xee9   :  { %v7613_v9 = vpop.xlane.xlu1 %7612  ;;  %v7620_v10 = vmul.f32 %v9418_v5, %v7604_v48 }
 0xeea   :  { %v7615_v11 = vmul.f32 0.03125, %v7613_v9 }
 0xeeb   :  { %v7628_v15 = vmul.f32 %v8013_v7, %v7620_v10 }
 0xeec   :  { %v7617_v17 = vadd.f32 1e-06, %v7615_v11 }
 0xeed   :  { %v7636_v18 = vadd.f32 %v8014_v13, %v7628_v15 }
 0xeee   :  { %9419 = vrsqrt.f32 %v7617_v17 }
 0xeef   :  { %9053 = vmatprep.mubr.msk.f32.mxu0 %vm3671_vm3, %v7636_v18 }
 0xef8   :  { %v9420_v19 = vpop.eup %9419 }
 0xef9   :  { %v7621_v21 = vmul.f32 %v9420_v19, %v7605_v4 }
 0xefb   :  { %v7629_v23 = vmul.f32 %v8013_v7, %v7621_v21 }
 0xefd   :  { %v7637_v25 = vadd.f32 %v8014_v13, %v7629_v23 }
 0xeff   :  { %9054 = vmatmul.mubr.msk.f32.vlgmr.msra.gmra.mrb[100].mxu0 %vm3671_vm3, %v7637_v25 }
 0xfd2   :  { %v9055_v29 = vpop.f32.mrb[100].mxu0 }
 0xfd3   :  { %v7727_v31 = vadd.f32 %v9055_v29, %v8015_v28  ;;  %v7721_v32 = vpop.f32.mrb[101].mxu0 }
 0xfd4   :  { %v7722_v33 = vadd.f32 %v8015_v28, %v7721_v32 }
 0xfd5   :  { %v7731_v35 = vmax.f32 %v7727_v31, 0.0 }
 0xfd6   :  { %v7730_v34 = vmax.f32 %v7722_v33, 0.0 }
 0xfd8   :  { %9072 = vmatprep.mubr.msk.f32.mxu1 %vm3840_vm4, %v7730_v34 }
 0xfd9   :  { %9073 = vmatmul.mubr.msk.f32.vlgmr.msra.gmra.mrb[96].mxu1 %vm3840_vm4, %v7731_v35 }
0x10ac   :  { %v9074_v37 = vpop.f32.mrb[96].mxu1 }
0x10ad   :  { %v7825_v39 = vadd.f32 %v9074_v37, %v8018_v36  ;;  %v7819_v3 = vpop.f32.mrb[97].mxu1 }
0x10ae   :  { %v7820_v40 = vadd.f32 %v8018_v36, %v7819_v3 }
0x10af   :  { %v7833_v41 = vsel %vm91_vm1, %v7825_v39, 0.0 }
0x10b0   :  { %7834 = vadd.xlane.f32.xlu1 %v7833_v41  ;;  %v7830_v22 = vsel %vm91_vm1, %v7820_v40, 0.0 }
0x10b1   :  { %7831 = vadd.xlane.f32.xlu0 %v7830_v22 }
0x113d   :  { %v7835_v42 = vpop.xlane.xlu1 %7834 }
0x113e   :  { %v7838_v43 = vmul.f32 0.0625, %v7835_v42  ;;  %v7832_v44 = vpop.xlane.xlu0 %7831 }
0x113f   :  { %v7837_v45 = vmul.f32 0.0625, %v7832_v44 }
0x1140   :  { %v7840_v30 = vsub.f32 %v7825_v39, %v7838_v43 }
0x1141   :  { %v7839_v24 = vsub.f32 %v7820_v40, %v7837_v45 }
0x1142   :  { %v7842_v46 = vmul.f32 %v7840_v30, %v7840_v30 }
0x1143   :  { %v7841_v47 = vmul.f32 %v7839_v24, %v7839_v24 }
0x1144   :  { %v7846_v48 = vsel %vm91_vm1, %v7842_v46, 0.0 }
0x1145   :  { %7847 = vadd.xlane.f32.xlu1 %v7846_v48  ;;  %v7843_v63 = vsel %vm91_vm1, %v7841_v47, 0.0 }
0x1146   :  { %7844 = vadd.xlane.f32.xlu0 %v7843_v63 }
0x11d2   :  { %v7848_v0 = vpop.xlane.xlu1 %7847 }
0x11d3   :  { %v7850_v49 = vmul.f32 0.0625, %v7848_v0  ;;  %v7845_v50 = vpop.xlane.xlu0 %7844 }
0x11d4   :  { %v7849_v4 = vmul.f32 0.0625, %v7845_v50 }
0x11d5   :  { %v7852_v51 = vadd.f32 1e-06, %v7850_v49 }
0x11d6   :  { %v7851_v52 = vadd.f32 1e-06, %v7849_v4 }
0x11d7   :  { %9421 = vrsqrt.f32 %v7852_v51 }
0x11d8   :  { %9423 = vrsqrt.f32 %v7851_v52 }
0x11e1   :  { %v9422_v38 = vpop.eup %9421 }
0x11e2   :  { %v9424_v53 = vpop.eup %9423  ;;  %v7856_v54 = vmul.f32 %v9422_v38, %v7840_v30 }
0x11e3   :  { %v7855_v55 = vmul.f32 %v9424_v53, %v7839_v24 }
0x11e4   :  { %v7864_v57 = vmul.f32 %v8021_v6, %v7856_v54 }
0x11e5   :  { %v7863_v58 = vmul.f32 %v8021_v6, %v7855_v55 }
0x11e6   :  { %v7872_v20 = vadd.f32 %v8022_v56, %v7864_v57 }
0x11e7   :  { %v7871_v59 = vadd.f32 %v8022_v56, %v7863_v58 }
0x11e8   :  { %7874 = vst.msk [vmem:[#allocation2 + $0x8] sm:$0xff] %vm91_vm1, %v7872_v20 }
0x11e9   :  { %7873 = vst.msk [vmem:[#allocation2] sm:$0xff] %vm91_vm1, %v7871_v59 }
0x11ea   :  { %9436 = shalt.err (!%p9433_p4)
}
0x11eb   :  { %s9437_s29 = scalar_lea.hbm %s10568_s25, 256 }
0x11ec   :  { %p9438_p5 = scmp.ne.s32.totalorder %s10568_s25, %s9437_s29  ;;  %p9441_p6 = scmp.lt.u32.totalorder %s9437_s29, %s10568_s25 }
0x11ee   :  { %p9443_p7 = pnand %p9441_p6, %p9438_p5 }
0x11f0   :  { %9446 = shalt.err (!%p9443_p7)
}
0x11f1   :  { %s9453_s19 = smov 128   ;;  %s9454_s3 = smov 8  }
0x11f2   :  { %7886 = dma.vmem_to_hbm [thread:$0]  %s7881_s5, 256, %s10568_s25, [#allocation3], %s9453_s19, %s9453_s19, %s9454_s3  }
0x11f3   :  { %9447 = dma.done.wait [#allocation3], 256  }
0x11f4   :  { %9448 = vsyncadd [#allocation3], 4294967040 }
0x11f5   :  { %7890 = vsyncpa [#allocation3], 1 }

</bundles_post_ra>
